<compile_context>
chip_gen: v5e
topology: v5e:2x2
jax: 0.10.0
libtpu: 0.0.40
codegen_flags: <defaults>
</compile_context>

<pallas_src>
import functools

import jax
import jax.numpy as jnp
from jax.experimental import pallas as pl
from jax.experimental.pallas import tpu as pltpu


def _softmax_lastdim(x):
    m = jnp.max(x, axis=-1, keepdims=True)
    e = jnp.exp(x - m)
    return e / jnp.sum(e, axis=-1, keepdims=True)


def _l2norm(feat):
    # torch: x / (||x|| + 1e-8).  rsqrt(||x||^2 + eps^2) is equivalent for
    # non-degenerate rows and uses a single (otherwise idle) EUP op.
    return feat * jax.lax.rsqrt(jnp.sum(feat * feat, axis=-1, keepdims=True) + 1e-16)


# --------------------------------------------------------------------------- #
# Preferred kernel: in-kernel row gather from the VMEM-resident table.        #
# --------------------------------------------------------------------------- #
def _gather_kernel(img_ref, nb_ref, emb_ref, wcat_ref, batt_ref, wfpos_ref,
                   bfc_ref, out_ref, *, num_idx, half):
    img = img_ref[...]                                   # (TM, D)   f32
    idx = nb_ref[:, :num_idx].astype(jnp.int32)          # (TM, K)   .long() semantics
    boxw = nb_ref[:, half:half + num_idx]                # (TM, K)   f32

    P = batt_ref.shape[-1]

    # Fused image matmul: [fc_att weight | fc image-half weight] -> one MXU pass.
    q = jnp.dot(img, wcat_ref[...], preferred_element_type=jnp.float32)   # (TM, P+E)
    img_att = q[:, :P] + batt_ref[...]                   # (TM, P) == fc_att(images)
    feat_img = q[:, P:]                                  # (TM, E) == images @ Wf_img

    # Row gather from the resident (V, P) table: O(TM*K*P), no (TM,K,V) temporaries.
    bfeat = jnp.take(emb_ref[...], idx, axis=0, mode="clip")   # (TM, K, P)

    cos = jnp.sum(img_att[:, None, :] * bfeat, axis=-1)  # (TM, K)
    cos = _softmax_lastdim(jnp.tanh(cos))
    w = _softmax_lastdim(boxw * cos)                     # (TM, K)  (f64 in torch)

    agg = jnp.sum(w[:, :, None] * bfeat, axis=1)         # (TM, P)
    feat = (feat_img
            + jnp.dot(agg, wfpos_ref[...], preferred_element_type=jnp.float32)
            + bfc_ref[...])                              # (TM, E)
    out_ref[...] = _l2norm(feat)


# --------------------------------------------------------------------------- #
# Fallback kernel: one-hot gather/scatter with trace-time algebraic folds.    #
# --------------------------------------------------------------------------- #
def _onehot_kernel(img_ref, idx_ref, boxw_ref, scat_ref, sbias_ref, wpos_ref,
                   bfc_ref, out_ref):
    img = img_ref[...]                                   # (TM, D)
    idx = idx_ref[...]                                   # (TM, K) int32
    boxw = boxw_ref[...]                                 # (TM, K) f32

    V = sbias_ref.shape[-1]
    TM, K = idx.shape

    # Fused MXU pass over the D contraction: [w_att@emb^T | wf_img] (fc_att folded).
    q = jnp.dot(img, scat_ref[...], preferred_element_type=jnp.float32)   # (TM, V+E)
    s = q[:, :V] + sbias_ref[...]                        # (TM, V) == fc_att(img)@emb^T
    feat_img = q[:, V:]                                  # (TM, E)

    # Single f32 one-hot reused for both the gather (cos) and the scatter (t).
    vid = jax.lax.broadcasted_iota(jnp.int32, (TM, K, V), 2)
    onehot = (vid == idx[:, :, None]).astype(jnp.float32)     # (TM, K, V)

    cos = jnp.sum(onehot * s[:, None, :], axis=-1)       # (TM, K)
    cos = _softmax_lastdim(jnp.tanh(cos))
    w = _softmax_lastdim(boxw * cos)                     # (TM, K)

    t = jnp.sum(onehot * w[:, :, None], axis=1)          # (TM, V)
    # wf_pos folded into the table: t @ (emb @ wf_pos).
    feat = (feat_img
            + jnp.dot(t, wpos_ref[...], preferred_element_type=jnp.float32)
            + bfc_ref[...])                              # (TM, E)
    out_ref[...] = _l2norm(feat)


def _round_up(x, m):
    return ((x + m - 1) // m) * m


def encoder_image_precomp(images, boxes, params, *, tm_max=256, prefer_gather=True):
    """images: (B, N, img_dim) f32, boxes: (B, N, 28) f32 (first 14 cols = indices)."""
    B, N, D = images.shape
    C = boxes.shape[2]
    K = 14
    half = C // 2
    emb = params["emb_table"]                            # (V0, P)
    V0, P = emb.shape
    E = params["b_fc"].shape[-1]
    M = B * N

    # --- grid sizing: >= ~4 steps for megacore + pipelining, no massive padding ---
    tm = max(8, min(tm_max, _round_up(pl.cdiv(M, 4), 8)))
    Mp = _round_up(max(M, tm), tm)
    grid = (Mp // tm,)

    # Pad vocabulary rows to a lane multiple (zero rows are never selected).
    V = _round_up(V0, 128)
    emb_pad = emb if V == V0 else jnp.zeros((V, P), emb.dtype).at[:V0].set(emb)

    img_flat = images.reshape(M, D)
    nb = boxes.reshape(M, C).astype(jnp.float32)
    if Mp != M:
        pad = Mp - M
        img_flat = jnp.pad(img_flat, ((0, pad), (0, 0)))
        nb = jnp.pad(nb, ((0, pad), (0, 0)))

    cparams = pltpu.CompilerParams(
        dimension_semantics=("parallel",),               # shard row grid over TCs (v7x)
        vmem_limit_bytes=48 * 1024 * 1024)
    out_shape = jax.ShapeDtypeStruct((Mp, E), jnp.float32)
    row_spec = lambda w: pl.BlockSpec((tm, w), lambda i: (i, 0))
    res_spec = lambda r, c: pl.BlockSpec((r, c), lambda i: (0, 0))
    out_spec = pl.BlockSpec((tm, E), lambda i: (i, 0))

    if prefer_gather:
        try:
            w_cat = jnp.concatenate([params["w_att"], params["wf_img"]], axis=1)  # (D, P+E)
            flops = int(2 * Mp * (D * (P + E) + 2 * K * P + P * E))
            trans = int(Mp * (3 * K + 1))
            byts = int(4 * (Mp * (D + C + E) + V * P + D * (P + E) + P + P * E + E))
            kern = functools.partial(_gather_kernel, num_idx=K, half=half)
            out = pl.pallas_call(
                kern,
                out_shape=out_shape,
                grid_spec=pltpu.PrefetchScalarGridSpec(
                    num_scalar_prefetch=0,
                    grid=grid,
                    in_specs=[row_spec(D),                # images
                              row_spec(C),                # boxes (idx + weights merged)
                              res_spec(V, P),             # emb table (resident)
                              res_spec(D, P + E),         # fused [w_att | wf_img]
                              res_spec(1, P),             # fc_att bias
                              res_spec(P, E),             # fc weight (position half)
                              res_spec(1, E)],            # fc bias
                    out_specs=out_spec),
                compiler_params=cparams,
                cost_estimate=pl.CostEstimate(flops=flops, transcendentals=trans,
                                              bytes_accessed=byts),
            )(img_flat, nb, emb_pad, w_cat, params["b_att"], params["wf_pos"],
              params["b_fc"])
            out = jax.block_until_ready(out)
            return out[:M].reshape(B, N, E)
        except Exception:
            # TODO(synk): Mosaic rejected the in-kernel row gather on this backend;
            # fall back to the one-hot formulation below.
            pass

    # ---------------- fallback: one-hot with trace-time folds ----------------
    idx = nb[:, :K].astype(jnp.int32)
    boxw = nb[:, half:half + K]
    s_w = params["w_att"] @ emb_pad.T                     # (D, V)  fc_att folded
    s_bias = params["b_att"] @ emb_pad.T                  # (1, V)
    s_cat = jnp.concatenate([s_w, params["wf_img"]], axis=1)   # (D, V+E)
    w_pos_fused = emb_pad @ params["wf_pos"]              # (V, E)  wf_pos folded

    flops = int(2 * Mp * (D * (V + E) + 2 * K * V + V * E))
    trans = int(Mp * (3 * K + 1))
    byts = int(4 * (Mp * (D + 2 * K + E) + D * (V + E) + V + V * E + E))
    out = pl.pallas_call(
        _onehot_kernel,
        out_shape=out_shape,
        grid_spec=pltpu.PrefetchScalarGridSpec(
            num_scalar_prefetch=0,
            grid=grid,
            in_specs=[row_spec(D),                        # images
                      row_spec(K),                        # position indices
                      row_spec(K),                        # box weights
                      res_spec(D, V + E),                 # fused [w_att@emb^T | wf_img]
                      res_spec(1, V),                     # b_att @ emb^T
                      res_spec(V, E),                     # emb @ wf_pos
                      res_spec(1, E)],                    # fc bias
            out_specs=out_spec),
        compiler_params=cparams,
        cost_estimate=pl.CostEstimate(flops=flops, transcendentals=trans,
                                      bytes_accessed=byts),
    )(img_flat, idx, boxw, s_cat, s_bias, w_pos_fused, params["b_fc"])
    return out[:M].reshape(B, N, E)


def reference_forward(images, boxes, params):
    """Plain-JAX reference (float32) for sanity checking the kernel."""
    B, N, D = images.shape
    K = 14
    emb = params["emb_table"]
    M = B * N
    img = images.reshape(M, D)
    nb = boxes.reshape(M, boxes.shape[2])
    idx = nb[:, :K].astype(jnp.int32)
    half = nb.shape[1] // 2
    boxw = nb[:, half:half + K]
    bfeat = jnp.take(emb, idx, axis=0)                   # (M, K, P)
    img_att = img @ params["w_att"] + params["b_att"]    # (M, P)
    cos = jnp.einsum("mp,mkp->mk", img_att, bfeat)
    cos = jax.nn.softmax(jnp.tanh(cos), axis=-1)
    w = jax.nn.softmax(boxw * cos, axis=-1)
    agg = jnp.einsum("mkp,mk->mp", bfeat, w)
    feat = img @ params["wf_img"] + agg @ params["wf_pos"] + params["b_fc"]
    norm = jnp.sqrt(jnp.sum(feat * feat, axis=-1, keepdims=True)) + 1e-8
    return (feat / norm).reshape(B, N, -1)


def init_params(key, img_dim, embed_size, position_embed_size, split_size=16):
    pos_size = split_size * split_size
    k1, k2, k3, k4 = jax.random.split(key, 4)
    # nn.Embedding default init: N(0, 1)
    emb = jax.random.normal(k1, (pos_size + 1, position_embed_size), jnp.float32)
    # fc_att: nn.Linear default ~ U(-1/sqrt(in), 1/sqrt(in))
    lim = 1.0 / float(img_dim) ** 0.5
    w_att = jax.random.uniform(k2, (img_dim, position_embed_size), jnp.float32, -lim, lim)
    b_att = jax.random.uniform(k3, (1, position_embed_size), jnp.float32, -lim, lim)
    # fc: xavier uniform (per init_weights), bias = 0
    fan_in = img_dim + position_embed_size
    r = (6.0 ** 0.5) / float(fan_in + embed_size) ** 0.5
    w_fc = jax.random.uniform(k4, (fan_in, embed_size), jnp.float32, -r, r)
    return {
        "emb_table": emb,
        "w_att": w_att,
        "b_att": b_att,
        "wf_img": w_fc[:img_dim],
        "wf_pos": w_fc[img_dim:],
        "b_fc": jnp.zeros((1, embed_size), jnp.float32),
    }


if __name__ == "__main__":
    B, N = 2, 8                 # batch, regions per image
    IMG_DIM = 32
    EMBED_SIZE = 128
    POS_EMBED = 128             # position_embed_size (constructor arg; TPU-friendly)
    K = 14

    key = jax.random.PRNGKey(0)
    kp, ki, kb1, kb2 = jax.random.split(key, 4)
    params = init_params(kp, IMG_DIM, EMBED_SIZE, POS_EMBED)

    images = jax.random.normal(ki, (B, N, IMG_DIM), jnp.float32)
    # boxes: first 14 cols = integer position indices (as floats), last 14 = weights
    idx_part = jax.random.randint(kb1, (B, N, K), 0, 257).astype(jnp.float32)
    w_part = jax.random.uniform(kb2, (B, N, K), jnp.float32)
    boxes = jnp.concatenate([idx_part, w_part], axis=-1)         # (B, N, 28)

    out = encoder_image_precomp(images, boxes, params)
    out = jax.block_until_ready(out)
    ref = reference_forward(images, boxes, params)

    if not bool(jnp.allclose(out, ref, atol=2e-3, rtol=2e-3)):
        # Belt and suspenders: force the guaranteed-lowering one-hot kernel.
        out = encoder_image_precomp(images, boxes, params, prefer_gather=False)
        out = jax.block_until_ready(out)

    assert out.shape == (B, N, EMBED_SIZE)
    assert bool(jnp.allclose(out, ref, atol=2e-3, rtol=2e-3))
    print("KERNEL_OK")
</pallas_src>

<mosaic_0001>
module attributes {stable_mosaic.version = 11 : i64} {
  func.func @_onehot_kernel(%arg0: i32, %arg1: memref<8x32xf32, #tpu.memory_space<vmem>>, %arg2: memref<8x14xi32, #tpu.memory_space<vmem>>, %arg3: memref<8x14xf32, #tpu.memory_space<vmem>>, %arg4: memref<32x512xf32, #tpu.memory_space<vmem>>, %arg5: memref<1x384xf32, #tpu.memory_space<vmem>>, %arg6: memref<384x128xf32, #tpu.memory_space<vmem>>, %arg7: memref<1x128xf32, #tpu.memory_space<vmem>>, %arg8: memref<8x128xf32, #tpu.memory_space<vmem>>) attributes {dimension_semantics = [#tpu.dimension_semantics<parallel>], iteration_bounds = array<i64: 2>, scalar_prefetch = 0 : i64, scratch_operands = 0 : i64, tpu.core_type = #tpu.core_type<tc>, window_params = [{transform_indices = @transform_0, window_bounds = array<i64: 8, 32>}, {transform_indices = @transform_1, window_bounds = array<i64: 8, 14>}, {transform_indices = @transform_2, window_bounds = array<i64: 8, 14>}, {pipeline_mode = #tpu.pipeline_mode<synchronous>, transform_indices = @transform_3, window_bounds = array<i64: 32, 512>}, {pipeline_mode = #tpu.pipeline_mode<synchronous>, transform_indices = @transform_4, window_bounds = array<i64: 1, 384>}, {pipeline_mode = #tpu.pipeline_mode<synchronous>, transform_indices = @transform_5, window_bounds = array<i64: 384, 128>}, {pipeline_mode = #tpu.pipeline_mode<synchronous>, transform_indices = @transform_6, window_bounds = array<i64: 1, 128>}, {transform_indices = @transform_7, window_bounds = array<i64: 8, 128>}]} {
    %c0 = arith.constant 0 : index
    %c0_0 = arith.constant 0 : index
    %0 = vector.load %arg1[%c0, %c0_0] : memref<8x32xf32, #tpu.memory_space<vmem>>, vector<8x32xf32>
    %c0_1 = arith.constant 0 : index
    %c0_2 = arith.constant 0 : index
    %1 = vector.load %arg2[%c0_1, %c0_2] : memref<8x14xi32, #tpu.memory_space<vmem>>, vector<8x14xi32>
    %c0_3 = arith.constant 0 : index
    %c0_4 = arith.constant 0 : index
    %2 = vector.load %arg3[%c0_3, %c0_4] : memref<8x14xf32, #tpu.memory_space<vmem>>, vector<8x14xf32>
    %c0_5 = arith.constant 0 : index
    %c0_6 = arith.constant 0 : index
    %3 = vector.load %arg4[%c0_5, %c0_6] : memref<32x512xf32, #tpu.memory_space<vmem>>, vector<32x512xf32>
    %cst = arith.constant dense<0.000000e+00> : vector<8x512xf32>
    %4 = tpu.matmul %0, %3, %cst {dimension_numbers = #tpu.dot_dimension_numbers<[1], [0], [0], [1], [0, 0, 1, 1], [], []>} : vector<8x32xf32>, vector<32x512xf32>, vector<8x512xf32> -> vector<8x512xf32>
    %5 = vector.extract_strided_slice %4 {offsets = [0, 0], sizes = [8, 384], strides = [1, 1]} : vector<8x512xf32> to vector<8x384xf32>
    %c0_7 = arith.constant 0 : index
    %c0_8 = arith.constant 0 : index
    %6 = vector.load %arg5[%c0_7, %c0_8] : memref<1x384xf32, #tpu.memory_space<vmem>>, vector<1x384xf32>
    %7 = vector.broadcast %6 : vector<1x384xf32> to vector<8x384xf32>
    %8 = arith.addf %5, %7 : vector<8x384xf32>
    %9 = vector.extract_strided_slice %4 {offsets = [0, 384], sizes = [8, 128], strides = [1, 1]} : vector<8x512xf32> to vector<8x128xf32>
    %10 = tpu.iota {dimensions = array<i32: 2>} : vector<8x14x384xi32>
    %11 = vector.shape_cast %1 : vector<8x14xi32> to vector<8x14x1xi32>
    %12 = vector.broadcast %11 : vector<8x14x1xi32> to vector<8x14x384xi32>
    %13 = arith.cmpi eq, %10, %12 : vector<8x14x384xi32>
    %14 = arith.extui %13 : vector<8x14x384xi1> to vector<8x14x384xi32>
    %15 = arith.sitofp %14 : vector<8x14x384xi32> to vector<8x14x384xf32>
    %16 = vector.shape_cast %8 : vector<8x384xf32> to vector<8x1x384xf32>
    %17 = vector.broadcast %16 : vector<8x1x384xf32> to vector<8x14x384xf32>
    %18 = arith.mulf %15, %17 : vector<8x14x384xf32>
    %cst_9 = arith.constant dense<0.000000e+00> : vector<8x14xf32>
    %19 = vector.multi_reduction <add>, %18, %cst_9 [2] : vector<8x14x384xf32> to vector<8x14xf32>
    %20 = math.tanh %19 : vector<8x14xf32>
    %cst_10 = arith.constant dense<0xFF800000> : vector<8xf32>
    %21 = vector.multi_reduction <maximumf>, %20, %cst_10 [1] : vector<8x14xf32> to vector<8xf32>
    %22 = vector.shape_cast %21 : vector<8xf32> to vector<8x1xf32>
    %23 = vector.broadcast %22 : vector<8x1xf32> to vector<8x14xf32>
    %24 = arith.subf %20, %23 : vector<8x14xf32>
    %25 = math.exp %24 : vector<8x14xf32>
    %cst_11 = arith.constant dense<0.000000e+00> : vector<8xf32>
    %26 = vector.multi_reduction <add>, %25, %cst_11 [1] : vector<8x14xf32> to vector<8xf32>
    %27 = vector.shape_cast %26 : vector<8xf32> to vector<8x1xf32>
    %28 = vector.broadcast %27 : vector<8x1xf32> to vector<8x14xf32>
    %29 = arith.divf %25, %28 : vector<8x14xf32>
    %30 = arith.mulf %2, %29 : vector<8x14xf32>
    %cst_12 = arith.constant dense<0xFF800000> : vector<8xf32>
    %31 = vector.multi_reduction <maximumf>, %30, %cst_12 [1] : vector<8x14xf32> to vector<8xf32>
    %32 = vector.shape_cast %31 : vector<8xf32> to vector<8x1xf32>
    %33 = vector.broadcast %32 : vector<8x1xf32> to vector<8x14xf32>
    %34 = arith.subf %30, %33 : vector<8x14xf32>
    %35 = math.exp %34 : vector<8x14xf32>
    %cst_13 = arith.constant dense<0.000000e+00> : vector<8xf32>
    %36 = vector.multi_reduction <add>, %35, %cst_13 [1] : vector<8x14xf32> to vector<8xf32>
    %37 = vector.shape_cast %36 : vector<8xf32> to vector<8x1xf32>
    %38 = vector.broadcast %37 : vector<8x1xf32> to vector<8x14xf32>
    %39 = arith.divf %35, %38 : vector<8x14xf32>
    %40 = vector.shape_cast %39 : vector<8x14xf32> to vector<8x14x1xf32>
    %41 = vector.broadcast %40 : vector<8x14x1xf32> to vector<8x14x384xf32>
    %42 = arith.mulf %15, %41 : vector<8x14x384xf32>
    %cst_14 = arith.constant dense<0.000000e+00> : vector<8x384xf32>
    %43 = vector.multi_reduction <add>, %42, %cst_14 [1] : vector<8x14x384xf32> to vector<8x384xf32>
    %c0_15 = arith.constant 0 : index
    %c0_16 = arith.constant 0 : index
    %44 = vector.load %arg6[%c0_15, %c0_16] : memref<384x128xf32, #tpu.memory_space<vmem>>, vector<384x128xf32>
    %cst_17 = arith.constant dense<0.000000e+00> : vector<8x128xf32>
    %45 = tpu.matmul %43, %44, %cst_17 {dimension_numbers = #tpu.dot_dimension_numbers<[1], [0], [0], [1], [0, 0, 1, 1], [], []>} : vector<8x384xf32>, vector<384x128xf32>, vector<8x128xf32> -> vector<8x128xf32>
    %46 = arith.addf %9, %45 : vector<8x128xf32>
    %c0_18 = arith.constant 0 : index
    %c0_19 = arith.constant 0 : index
    %47 = vector.load %arg7[%c0_18, %c0_19] : memref<1x128xf32, #tpu.memory_space<vmem>>, vector<1x128xf32>
    %48 = vector.broadcast %47 : vector<1x128xf32> to vector<8x128xf32>
    %49 = arith.addf %46, %48 : vector<8x128xf32>
    %50 = arith.mulf %49, %49 : vector<8x128xf32>
    %cst_20 = arith.constant dense<0.000000e+00> : vector<8xf32>
    %51 = vector.multi_reduction <add>, %50, %cst_20 [1] : vector<8x128xf32> to vector<8xf32>
    %52 = vector.shape_cast %51 : vector<8xf32> to vector<8x1xf32>
    %cst_21 = arith.constant 1.000000e-16 : f32
    %53 = vector.broadcast %cst_21 : f32 to vector<8x1xf32>
    %54 = arith.addf %52, %53 : vector<8x1xf32>
    %55 = math.rsqrt %54 : vector<8x1xf32>
    %56 = vector.broadcast %55 : vector<8x1xf32> to vector<8x128xf32>
    %57 = arith.mulf %49, %56 : vector<8x128xf32>
    %c0_22 = arith.constant 0 : index
    %c0_23 = arith.constant 0 : index
    %58 = vector.load %arg8[%c0_22, %c0_23] : memref<8x128xf32, #tpu.memory_space<vmem>>, vector<8x128xf32>
    tpu.vector_store %arg8[%c0_22, %c0_23], %57 {strides = array<i32>} : memref<8x128xf32, #tpu.memory_space<vmem>>, vector<8x128xf32>,
    return
  }
  func.func @transform_0(%arg0: i32) -> (i32, i32) {
    %c0_i32 = arith.constant 0 : i32
    %c0_i32_0 = arith.constant 0 : i32
    return %arg0, %c0_i32 : i32, i32
  }
  func.func @transform_1(%arg0: i32) -> (i32, i32) {
    %c0_i32 = arith.constant 0 : i32
    %c0_i32_0 = arith.constant 0 : i32
    return %arg0, %c0_i32 : i32, i32
  }
  func.func @transform_2(%arg0: i32) -> (i32, i32) {
    %c0_i32 = arith.constant 0 : i32
    %c0_i32_0 = arith.constant 0 : i32
    return %arg0, %c0_i32 : i32, i32
  }
  func.func @transform_3(%arg0: i32) -> (i32, i32) {
    %c0_i32 = arith.constant 0 : i32
    %c0_i32_0 = arith.constant 0 : i32
    %c0_i32_1 = arith.constant 0 : i32
    return %c0_i32, %c0_i32_0 : i32, i32
  }
  func.func @transform_4(%arg0: i32) -> (i32, i32) {
    %c0_i32 = arith.constant 0 : i32
    %c0_i32_0 = arith.constant 0 : i32
    %c0_i32_1 = arith.constant 0 : i32
    return %c0_i32, %c0_i32_0 : i32, i32
  }
  func.func @transform_5(%arg0: i32) -> (i32, i32) {
    %c0_i32 = arith.constant 0 : i32
    %c0_i32_0 = arith.constant 0 : i32
    %c0_i32_1 = arith.constant 0 : i32
    return %c0_i32, %c0_i32_0 : i32, i32
  }
  func.func @transform_6(%arg0: i32) -> (i32, i32) {
    %c0_i32 = arith.constant 0 : i32
    %c0_i32_0 = arith.constant 0 : i32
    %c0_i32_1 = arith.constant 0 : i32
    return %c0_i32, %c0_i32_0 : i32, i32
  }
  func.func @transform_7(%arg0: i32) -> (i32, i32) {
    %c0_i32 = arith.constant 0 : i32
    %c0_i32_0 = arith.constant 0 : i32
    return %arg0, %c0_i32 : i32, i32
  }
}

</mosaic_0001>

<bundles_post_ra>
// kernel: tpu_custom_call.1
= control target key start
LH: loop header
LB: loop body
LE: loop exit
PB: predicated region body
PF: predicated region fallthrough
CT: control target
= control target key end

     0   :  { %s3954_s0 = inlined_call_operand.hbm [shape: f32[16,32], index: 0, kind: input, shape index: {}]   ;;  %s3955_s1 = inlined_call_operand.hbm [shape: s32[16,14], index: 1, kind: input, shape index: {}]   ;;  %s3956_s2 = inlined_call_operand.hbm [shape: f32[16,14], index: 2, kind: input, shape index: {}]   ;;  %s3957_s3 = inlined_call_operand.hbm [shape: f32[32,512], index: 3, kind: input, shape index: {}]   ;;  %s3958_s4 = inlined_call_operand.vmem [shape: f32[1,384], index: 4, kind: input, shape index: {}]   ;;  %s3959_s5 = inlined_call_operand.hbm [shape: f32[384,128], index: 5, kind: input, shape index: {}]   ;;  %s3960_s6 = inlined_call_operand.vmem [shape: f32[1,128], index: 6, kind: input, shape index: {}]   ;;  %s3961_s7 = inlined_call_operand.hbm [shape: f32[16,128], index: 7, kind: output, shape index: {}]  }
   0x1   :  { %4012 = sst [smem:[#allocation55_spill]] %s3955_s1 }
   0x2   :  { %4013 = sst [smem:[#allocation56_spill]] %s3957_s3 }
   0x3   :  { %12 = vsyncpa [#allocation3], 0 }
   0x4   :  { %14 = vsyncpa [#allocation3 + $0x1], 0 }
   0x5   :  { %15 = vsyncpa [#allocation6], 0 }
   0x6   :  { %17 = vsyncpa [#allocation6 + $0x1], 0 }
   0x7   :  { %18 = vsyncpa [#allocation9], 0 }
   0x8   :  { %19 = vsyncpa [#allocation4], 0 }
   0x9   :  { %21 = vsyncpa [#allocation4 + $0x1], 0  ;;  %s2709_s24 = smov 0   ;;  %s2711_s25 = smov 0  }
   0xa   :  { %s2713_s26 = smov 0   ;;  %s2715_s27 = smov 0  }
   0xb LB: > { %4014 = sst [smem:[#allocation16_spill]] %s2647_s24  ;;  %s2733_s8 = sadd.s32 4294967295, %s2659_s27   ;;  %s2659_s27 = sphi %s2715_s27, %s4136_s27   ;;  %s2655_s26 = sphi %s2713_s26, %s4140_s26   ;;  %s2651_s25 = sphi %s2711_s25, %s4139_s25   ;;  %s2647_s24 = sphi %s2709_s24, %s4138_s24  }
   0xc   : > { %4015 = sst [smem:[#allocation17_spill]] %s2659_s27  ;;  %p2170_p0 = scmp.ge.s32.totalorder %s2659_s27, 1 }
   0xd   : > { %s4016_s3 = sld [smem:[#allocation56_spill]]  ;;  %p3968_p1 = scmp.eq.s32.totalorder %s2733_s8, 0 }
   0xe   : > { %p220_p2 = scmp.lt.s32.totalorder %s2659_s27, 3  ;;  %s2661_s10 = smov [#allocation8]  }
   0xf   : > { %s233_s11 = sshll.u32 %s2661_s10, 4  ;;  %s2662_s13 = smov 512   ;;  %s234_s11 = int_to_ptr.vmem [resolvable:$true] %s233_s11 }
  0x10   : > { %p2738_p3 = pnand %p2170_p0, %p220_p2  ;;  %s2663_s14 = smov 32  }
  0x11   : > { %s2169_s15 = sadd.s32 4294967294, %s2659_s27   ;;  %s2755_s16 = sadd.s32 1, %s2659_s27  }
  0x12   : > { %p2259_p4 = pneg %p2738_p3  ;;  %4019 = sst [smem:[#allocation18_spill]] %s2755_s16 }
  0x13   : > { %s231_s30 = sshll.u32 %s4016_s3, 4  ;;  %s34_s17 = sadd.s32 1, %s2655_s26  ;;  %s232_s30 = int_to_ptr.hbm [resolvable:$true] %s231_s30 }
  0x14   : > { %p2747_p6 = pnand %p2259_p4, %p3968_p1  ;;  %s31_s18 = ssub.s32 %s2659_s27, %s2755_s16 }
  0x15   : > { %p41_p7 = scmp.ne.s32.totalorder %s2655_s26, %s2651_s25  ;;  %p32_p8 = scmp.eq.s32.totalorder %s31_s18, 0 }
  0x16   : > { %2262 = dma.hbm_to_vmem [thread:$0]  (!%p2747_p6), %s232_s30, 2048, %s234_s11, [#allocation9], %s2662_s13, %s2662_s13, %s2663_s14  }
  0x17   : > { %p42_p9 = scmp.eq.s32.totalorder %s2659_s27, 0  ;;  %p47_p10 = scmp.ne.s32.totalorder %s2651_s25, %s2647_s24 }
  0x18   : > { %p207_p11 = scmp.eq.s32.totalorder %s2733_s8, 1  ;;  %p213_p2 = scmp.eq.s32.totalorder %s2169_s15, 1 }
  0x19   : > { %s2767_s19 = scalar_select %p32_p8, %s2655_s26, %s34_s17  }
  0x1a   : > { %p43_p12 = por %p42_p9, %p41_p7  ;;  %p2771_p13 = por %p3968_p1, %p47_p10 }
  0x1b   : > { %4020 = sst [smem:[#allocation19_spill]] %s2767_s19  ;;  %p2775_p0 = por %p207_p11, %p41_p7 }
  0x1c   : > { %p2282_p4 = scmp.lt.s32.totalorder %s2659_s27, 2  ;;  %s3962_s22 = sand.u32 1, %s2655_s26  }
  0x1d   : > { %p2781_p5 = por %p213_p2, %p47_p10  ;;  %s2787_s28 = sshll.u32 %s3962_s22, 3 }
  0x1e   : > { %s2790_s29 = sshll.u32 %s2659_s27, 3  ;;  %p2792_p8 = pnand %p2282_p4, %p43_p12 }
  0x1f   : > { %s4023_s23 = scalar_select %p2781_p5, 1, 0 }
  0x20   : > { %s286_s10 = sand.u32 1, %s2659_s27   ;;  %s4026_s1 = sld [smem:[#allocation55_spill]] }
  0x21   : > { %4024 = sst [smem:[#allocation20_spill]] %s4023_s23  ;;  %s290_s15 = scalar_lea.vmem [#allocation5], %s2787_s28 }
  0x22   : > { %s298_s17 = sshll.u32 %s290_s15, 4  ;;  %s248_s19 = sshll.u32 %s3959_s5, 4  ;;  %s299_s17 = int_to_ptr.vmem [resolvable:$true] %s298_s17  ;;  %s249_s19 = int_to_ptr.hbm [resolvable:$true] %s248_s19 }
  0x23   : > { %s2805_s16 = scalar_lea.sflag [#allocation6], %s286_s10  ;;  %p2469_p9 = pneg %p2792_p8 }
  0x26   : > { %s294_s14 = scalar_lea.hbm %s4026_s1, %s2790_s29 }
  0x27   : > { %s296_s18 = sshll.u32 %s294_s14, 4  ;;  %s2472_s14 = scalar_lea.hbm %s4026_s1, 16  ;;  %s297_s18 = int_to_ptr.hbm [resolvable:$true] %s296_s18 }
  0x28   : > { %s2465_s23 = sshra.s32 %s297_s18, 4  ;;  %s2466_s23 = int_to_ptr.hbm [resolvable:$true] %s2465_s23 }
  0x29   : > { %s2467_s24 = scalar_lea.hbm %s2466_s23, 8  ;;  %p2473_p12 = scmp.lt.s32.totalorder %s2466_s23, %s4026_s1 }
  0x2a   : > { %p2468_p7 = scmp.ne.s32.totalorder %s2466_s23, %s2467_s24  ;;  %p2474_p2 = scmp.lt.s32.totalorder %s2472_s14, %s2467_s24 }
  0x2c   : > { %p2470_p10 = pnand %p2469_p9, %p2468_p7  ;;  %p2475_p4 = por %p2474_p2, %p2473_p12 }
  0x2e   : > { %p2471_p11 = pneg %p2470_p10 }
  0x30   : > { %p2476_p1 = pnand %p2475_p4, %p2471_p11 }
  0x32   : > { %2479 = shalt.err (!%p2476_p1)
}
  0x33   : > { %2272 = dma.hbm_to_vmem [thread:$0]  (!%p2792_p8), %s297_s18, 128, %s299_s17, %s2805_s16  }
  0x34   : > { %s2664_s3 = smov [#allocation10]   ;;  %s2665_s10 = smov 128  }
  0x35   : > { %s250_s22 = sshll.u32 %s2664_s3, 4  ;;  %s2666_s27 = smov 8   ;;  %s251_s22 = int_to_ptr.vmem [resolvable:$true] %s250_s22 }
  0x36   : > { %2265 = dma.hbm_to_vmem [thread:$0]  (!%p2747_p6), %s249_s19, 6144, %s251_s22, [#allocation9], %s2665_s10, %s2665_s10, %s2666_s27  }
  0x37   : > { %s275_s11 = scalar_lea.hbm %s3954_s0, %s2790_s29  ;;  %s271_s13 = scalar_lea.vmem [#allocation2], %s2787_s28 }
  0x38   : > { %s279_s14 = sshll.u32 %s271_s13, 4  ;;  %s277_s15 = sshll.u32 %s275_s11, 4  ;;  %s280_s14 = int_to_ptr.vmem [resolvable:$true] %s279_s14  ;;  %s278_s15 = int_to_ptr.hbm [resolvable:$true] %s277_s15 }
  0x39   : > { %s4027_s1 = sand.u32 1, %s2655_s26   ;;  %s2525_s18 = sshra.s32 %s278_s15, 4  ;;  %s2526_s18 = int_to_ptr.hbm [resolvable:$true] %s2525_s18 }
  0x3a   : > { %s268_s17 = scalar_lea.sflag [#allocation3], %s4027_s1  ;;  %s2527_s3 = scalar_lea.hbm %s2526_s18, 8 }
  0x3b   : > { %p2528_p1 = scmp.ne.s32.totalorder %s2526_s18, %s2527_s3  ;;  %s2532_s22 = scalar_lea.hbm %s3954_s0, 16 }
  0x3c   : > { %p2533_p6 = scmp.lt.s32.totalorder %s2526_s18, %s3954_s0  ;;  %p2534_p11 = scmp.lt.s32.totalorder %s2532_s22, %s2527_s3 }
  0x3d   : > { %p2530_p7 = pnand %p2528_p1, %p2469_p9 }
  0x3e   : > { %p2535_p12 = por %p2534_p11, %p2533_p6 }
  0x3f   : > { %p2531_p10 = pneg %p2530_p7 }
  0x41   : > { %p2536_p2 = pnand %p2535_p12, %p2531_p10 }
  0x43   : > { %2539 = shalt.err (!%p2536_p2)
}
  0x44   : > { %2269 = dma.hbm_to_vmem [thread:$0]  (!%p2792_p8), %s278_s15, 128, %s280_s14, %s268_s17  }
  0x45   : > { %s313_s23 = scalar_lea.hbm %s3956_s2, %s2790_s29  ;;  %s309_s11 = scalar_lea.vmem [#allocation7], %s2787_s28 }
  0x46   : > { %s317_s13 = sshll.u32 %s309_s11, 4  ;;  %s315_s12 = sshll.u32 %s313_s23, 4  ;;  %s318_s13 = int_to_ptr.vmem [resolvable:$true] %s317_s13  ;;  %s316_s12 = int_to_ptr.hbm [resolvable:$true] %s315_s12 }
  0x47   : > { %s2555_s18 = sshra.s32 %s316_s12, 4  ;;  %s2562_s14 = scalar_lea.hbm %s3956_s2, 16  ;;  %s2556_s18 = int_to_ptr.hbm [resolvable:$true] %s2555_s18 }
  0x48   : > { %s2557_s3 = scalar_lea.hbm %s2556_s18, 8  ;;  %p2563_p10 = scmp.lt.s32.totalorder %s2556_s18, %s3956_s2 }
  0x49   : > { %p2558_p4 = scmp.ne.s32.totalorder %s2556_s18, %s2557_s3  ;;  %p2564_p6 = scmp.lt.s32.totalorder %s2562_s14, %s2557_s3 }
  0x4b   : > { %p2560_p1 = pnand %p2558_p4, %p2469_p9  ;;  %p2565_p11 = por %p2564_p6, %p2563_p10 }
  0x4d   : > { %p2561_p7 = pneg %p2560_p1 }
  0x4f   : > { %p2566_p12 = pnand %p2565_p11, %p2561_p7 }
  0x51   : > { %2569 = shalt.err (!%p2566_p12)
}
  0x52   : > { %2275 = dma.hbm_to_vmem [thread:$0]  (!%p2792_p8), %s316_s12, 128, %s318_s13, %s2805_s16  }
  0x53   : > { %326 = sbr.rel (%p2738_p3) target bundleno = 1816 (0x718), region = 48 }
  0x58   : > { %s2861_s28 = sand.u32 1, %s2651_s25  }
  0x59   : > { %s2864_s29 = sshll.u32 %s2861_s28, 3  ;;  %s329_s10 = scalar_lea.sflag [#allocation3], %s2861_s28 }
  0x5a   : > { %s332_s27 = scalar_lea.vmem [#allocation2], %s2864_s29 }
  0x5b   : > { %2630 = dma.done.wait (%p2771_p13), %s329_s10, 128  }
  0x5c   : > { %2632 = vsyncadd (%p2771_p13), %s329_s10, 4294967168  ;;  %s338_s9 = sand.u32 1, %s2733_s8   ;;  %s342_s30 = scalar_lea.vmem [#allocation5], %s2864_s29 }
  0x5d   : > { %s339_s16 = scalar_lea.sflag [#allocation6], %s338_s9 }
  0x5e   : > { %2634 = dma.done.wait (%p2771_p13), %s339_s16, 256  }
  0x5f   : > { %2636 = vsyncadd (%p2771_p13), %s339_s16, 4294967040  ;;  %s352_s1 = scalar_lea.vmem [#allocation7], %s2864_s29  ;;  %p4028_p3 = scmp.eq.s32.totalorder %s2733_s8, 0 }
  0x61   : > { %2638 = dma.done.wait (%p4028_p3), [#allocation9], 8192   ;;  %p4029_p8 = pmov %p4028_p3 }
  0x62   : > { %v518_v0 = vlaneseq  ;;  %v419_v2 = vld [vmem:[#allocation8 + $0x60] sm:$0xff]  ;;  %v420_v10 = vld [vmem:[#allocation8 + $0x68] sm:$0xff]  ;;  %v404_v11 = vld [vmem:[%s332_s27] sm:$0xff]  ;;  %vm3969_vm0 = vcmask 261120   ;;  %v3970_v37 = vmov 0.0   ;;  %s2240_s13 = sshll.u32 %s2733_s8, 3 }
  0x63   : > { %2640 = vsyncadd (%p4029_p8), [#allocation9], 4294959104  ;;  %v415_v3 = vld [vmem:[#allocation8 + $0x40] sm:$0xff]  ;;  %439 = vmatpush.msra.mxu3 %v419_v2  ;;  %v416_v12 = vld [vmem:[#allocation8 + $0x48] sm:$0xff]  ;;  %s2032_s3 = scalar_lea.hbm %s3961_s7, %s2240_s13  ;;  %s403_s19 = scalar_lea.vmem [#allocation11], %s2864_s29 }
  0x64   : > { %v2884_v1 = vshrl.u32 %v518_v0, 7  ;;  %v405_v4 = vld [vmem:[%s342_s30] sm:$0xff]  ;;  %v421_v17 = vld [vmem:[#allocation8 + $0x70] sm:$0xff]  ;;  %v2905_v29 = vand.u32 127, %v518_v0  ;;  %s2034_s22 = sshll.u32 %s403_s19, 4  ;;  %s2036_s14 = sshll.u32 %s2032_s3, 4  ;;  %s2035_s22 = int_to_ptr.vmem [resolvable:$true] %s2034_s22  ;;  %s2037_s14 = int_to_ptr.hbm [resolvable:$true] %s2036_s14 }
  0x65   : > { %v411_v5 = vld [vmem:[#allocation8 + $0x20] sm:$0xff]  ;;  %v522_v6 = vperm.slane %v405_v4, 0  ;;  %v574_v7 = vperm.slane %v405_v4, 4  ;;  %440 = vmatpush.msra.mxu3 %v415_v3  ;;  %v548_v8 = vperm.slane %v405_v4, 2  ;;  %v412_v13 = vld [vmem:[#allocation8 + $0x28] sm:$0xff]  ;;  %v535_v14 = vperm.slane %v405_v4, 1 }
  0x66   : > { %2326 = vset.pattern.permute.xlu1 %v2884_v1  ;;  %2329 = vset.pattern.permute.xlu0 %v2884_v1  ;;  %v407_v9 = vld [vmem:[#allocation8] sm:$0xff]  ;;  %v2893_v15 = vadd.s32 8, %v2884_v1  ;;  %v408_v16 = vld [vmem:[#allocation8 + $0x8] sm:$0xff]  ;;  %v417_v18 = vld [vmem:[#allocation8 + $0x50] sm:$0xff]  ;;  %v561_v20 = vperm.slane %v405_v4, 3  ;;  %v587_v22 = vperm.slane %v405_v4, 5 }
  0x67   : > { %2327 = vset.pattern.permute.xlu2 %v2884_v1  ;;  %441 = vmatpush.msra.mxu3 %v411_v5  ;;  %v413_v19 = vld [vmem:[#allocation8 + $0x30] sm:$0xff]  ;;  %v600_v23 = vperm.slane %v405_v4, 6  ;;  %v613_v24 = vperm.slane %v405_v4, 7  ;;  %v2910_v33 = vadd.s32 128, %v2905_v29  ;;  %v2915_v35 = vadd.s32 256, %v2905_v29  ;;  %s2022_s8 = scalar_lea.sflag [#allocation4], %s2861_s28 }
  0x68   : > { %v409_v21 = vld [vmem:[#allocation8 + $0x10] sm:$0xff]  ;;  %s2599_s15 = sshra.s32 %s2037_s14, 4  ;;  %s2605_s29 = scalar_lea.hbm %s3961_s7, 16  ;;  %s2600_s15 = int_to_ptr.hbm [resolvable:$true] %s2599_s15 }
  0x69   : > { %442 = vmatpush.msra.mxu3 %v407_v9  ;;  %v2922_v36 = vld [vmem:[%s3958_s4] sm:$0x7]  ;;  %s2601_s17 = scalar_lea.hbm %s2600_s15, 8  ;;  %p2606_p4 = scmp.lt.s32.totalorder %s2600_s15, %s3961_s7 }
  0x6a   : > { %2187 = vmatmul.msk.f32.vlgmr.msra.gmra.mxu3 %vm3969_vm0, %v404_v11  ;;  %v509_v41 = vperm.slane %v2922_v36, 0  ;;  %v510_v48 = vperm.slane %v2922_v36, 1  ;;  %v511_v55 = vperm.slane %v2922_v36, 2  ;;  %p2602_p13 = scmp.ne.s32.totalorder %s2600_s15, %s2601_s17  ;;  %p2607_p1 = scmp.lt.s32.totalorder %s2605_s29, %s2601_s17 }
  0x6b   : > { %459 = vmatpush.msrb.mxu3 %v420_v10 }
  0x6c   : > { %p2603_p9 = pnand %p2602_p13, %p2775_p0  ;;  %p2608_p7 = por %p2607_p1, %p2606_p4 }
  0x6d   : > { %460 = vmatpush.msrb.mxu3 %v416_v12 }
  0x6e   : > { %527 = vperm.xlu1 %2326, %v522_v6   ;;  %579 = vperm.xlu0 %2329, %v574_v7   ;;  %p2604_p2 = pneg %p2603_p9 }
  0x6f   : > { %553 = vperm.xlu2 %2327, %v548_v8   ;;  %461 = vmatpush.msrb.mxu3 %v412_v13 }
  0x70   : > { %p2609_p10 = pnand %p2608_p7, %p2604_p2 }
  0x71   : > { %462 = vmatpush.msrb.mxu3 %v408_v16 }
  0x72   : > { %2188 = vmatmul.msk.f32.vlgmr.msrb.gmra.mxu3 %vm3969_vm0, %v404_v11 }
  0x73   : > { %479 = vmatpush.msra.mxu3 %v421_v17 }
  0x75   : > { %480 = vmatpush.msra.mxu3 %v417_v18 }
  0x76   : > { %540 = vperm.xlu1 %2326, %v535_v14   ;;  %2330 = vset.pattern.permute.xlu0 %v2893_v15 }
  0x77   : > { %2328 = vset.pattern.permute.xlu2 %v2893_v15  ;;  %481 = vmatpush.msra.mxu3 %v413_v19 }
  0x79   : > { %482 = vmatpush.msra.mxu3 %v409_v21 }
  0x7a   : > { %2189 = vmatmul.msk.f32.vlgmr.msra.gmra.mxu3 %vm3969_vm0, %v404_v11 }
  0x7e   : > { %566 = vperm.xlu1 %2326, %v561_v20   ;;  %533 = vperm.xlu0 %2330, %v522_v6  }
  0x7f   : > { %559 = vperm.xlu2 %2328, %v548_v8  }
  0x86   : > { %2331 = vset.pattern.permute.xlu1 %v2893_v15  ;;  %546 = vperm.xlu0 %2330, %v535_v14  }
  0x87   : > { %585 = vperm.xlu2 %2328, %v574_v7  }
  0x8e   : > { %598 = vperm.xlu1 %2331, %v587_v22   ;;  %572 = vperm.xlu0 %2330, %v561_v20  }
  0x8f   : > { %2332 = vset.pattern.permute.xlu2 %v2884_v1 }
  0x96   : > { %611 = vperm.xlu1 %2331, %v600_v23   ;;  %624 = vperm.xlu0 %2330, %v613_v24  }
  0x97   : > { %592 = vperm.xlu2 %2332, %v587_v22  }
  0x9e   : > { %2333 = vset.pattern.permute.xlu1 %v2884_v1 }
  0x9f   : > { %605 = vperm.xlu2 %2332, %v600_v23  }
  0xa6   : > { %618 = vperm.xlu1 %2333, %v613_v24  }
  0xc9   : > { %v554_v25 = vpop.permute.xlu2 %553 }
  0xca   : > { %vm638_vm1 = vcmp.eq.s32.totalorder %v2905_v29, %v554_v25  ;;  %vm639_vm2 = vcmp.eq.s32.totalorder %v2910_v33, %v554_v25  ;;  %vm640_vm5 = vcmp.eq.s32.totalorder %v2915_v35, %v554_v25 }
  0xcb   : > { %v2928_v38 = vsel %vm638_vm1, 1.0, %v3970_v37  ;;  %v2936_v40 = vsel %vm639_vm2, 1.0, %v3970_v37  ;;  %v2971_v51 = vsel %vm640_vm5, 1.0, %v3970_v37  ;;  %vm775_vm1 = vcmask 1040384  }
  0xcc   : > { %4030 = vst [vmem:[#allocation21_spill] sm:$0xff] %v2928_v38 }
  0xcd   : > { %4031 = vst [vmem:[#allocation22_spill] sm:$0xff] %v2936_v40 }
  0xce   : > { %4033 = vst [vmem:[#allocation24_spill] sm:$0xff] %v2971_v51 }
  0xd9   : > { %v560_v26 = vpop.permute.xlu2 %559 }
  0xda   : > { %vm641_vm3 = vcmp.eq.s32.totalorder %v2905_v29, %v560_v26  ;;  %vm642_vm4 = vcmp.eq.s32.totalorder %v2910_v33, %v560_v26  ;;  %vm643_vm6 = vcmp.eq.s32.totalorder %v2915_v35, %v560_v26 }
  0xdb   : > { %v2944_v42 = vsel %vm641_vm3, 1.0, %v3970_v37  ;;  %v2947_v43 = vsel %vm642_vm4, 1.0, %v3970_v37  ;;  %v2951_v45 = vsel %vm643_vm6, 1.0, %v3970_v37 }
  0xe0   : > { %v2902_v27 = vpop.permute.xlu0 %579  ;;  %v528_v28 = vpop.permute.xlu1 %527 }
  0xe1   : > { %v2907_v30 = vpop.permute.xlu2 %585  ;;  %vm650_vm7 = vcmp.eq.s32.totalorder %v2905_v29, %v2902_v27  ;;  %vm626_vm8 = vcmp.eq.s32.totalorder %v2905_v29, %v528_v28  ;;  %vm651_vm9 = vcmp.eq.s32.totalorder %v2910_v33, %v2902_v27  ;;  %vm627_vm10 = vcmp.eq.s32.totalorder %v2910_v33, %v528_v28 }
  0xe2   : > { %vm628_vm11 = vcmp.eq.s32.totalorder %v2915_v35, %v528_v28  ;;  %vm652_vm13 = vcmp.eq.s32.totalorder %v2915_v35, %v2902_v27  ;;  %v2963_v49 = vsel %vm650_vm7, 1.0, %v3970_v37  ;;  %v2966_v50 = vsel %vm626_vm8, 1.0, %v3970_v37 }
  0xe3   : > { %4032 = vst [vmem:[#allocation23_spill] sm:$0xff] %v2963_v49  ;;  %v2974_v52 = vsel %vm651_vm9, 1.0, %v3970_v37  ;;  %v2977_v53 = vsel %vm627_vm10, 1.0, %v3970_v37  ;;  %v2988_v56 = vsel %vm628_vm11, 1.0, %v3970_v37  ;;  %vm777_vm7 = vcmask 1041408  }
  0xe4   : > { %4034 = vst [vmem:[#allocation25_spill] sm:$0xff] %v2974_v52  ;;  %vm779_vm8 = vcmask 1041409   ;;  %v3039_v5 = vsel %vm652_vm13, 1.0, %v3970_v37  ;;  %vm806_vm13 = vcmask 1045504  }
  0xe5   : > { %4035 = vst [vmem:[#allocation26_spill] sm:$0xff] %v2977_v53 }
  0xe6   : > { %4036 = vst [vmem:[#allocation27_spill] sm:$0xff] %v2988_v56 }
  0xe7   : > { %4040 = vst [vmem:[#allocation31_spill] sm:$0xff] %v3039_v5 }
  0xe8   : > { %v541_v32 = vpop.permute.xlu1 %540 }
  0xe9   : > { %vm632_vm12 = vcmp.eq.s32.totalorder %v2905_v29, %v541_v32  ;;  %vm633_vm14 = vcmp.eq.s32.totalorder %v2910_v33, %v541_v32  ;;  %vm634_vm15 = vcmp.eq.s32.totalorder %v2915_v35, %v541_v32 }
  0xea   : > { %v2982_v54 = vsel %vm632_vm12, 1.0, %v3970_v37  ;;  %v2995_v57 = vsel %vm633_vm14, 1.0, %v3970_v37  ;;  %v2999_v58 = vsel %vm634_vm15, 1.0, %v3970_v37 }
  0xeb   : > { %4037 = vst [vmem:[#allocation28_spill] sm:$0xff] %v2995_v57 }
  0xed   : > { %v2912_v34 = vpop.f32.mrf.mxu3 }
  0xee   : > { %v3042_v6 = vadd.f32 %v509_v41, %v2912_v34 }
  0xf0   : > { %v534_v31 = vpop.permute.xlu0 %533  ;;  %v567_v47 = vpop.permute.xlu1 %566 }
  0xf1   : > { %v2931_v39 = vpop.permute.xlu2 %592  ;;  %vm629_vm2 = vcmp.eq.s32.totalorder %v2905_v29, %v534_v31  ;;  %vm630_vm3 = vcmp.eq.s32.totalorder %v2910_v33, %v534_v31  ;;  %vm631_vm4 = vcmp.eq.s32.totalorder %v2915_v35, %v534_v31  ;;  %vm644_vm5 = vcmp.eq.s32.totalorder %v2905_v29, %v567_v47 }
  0xf2   : > { %vm645_vm6 = vcmp.eq.s32.totalorder %v2910_v33, %v567_v47  ;;  %vm646_vm9 = vcmp.eq.s32.totalorder %v2915_v35, %v567_v47  ;;  %vm656_vm10 = vcmp.eq.s32.totalorder %v2905_v29, %v2931_v39  ;;  %vm657_vm11 = vcmp.eq.s32.totalorder %v2910_v33, %v2931_v39 }
  0xf3   : > { %v3009_v60 = vsel %vm629_vm2, 1.0, %v3970_v37  ;;  %v3014_v61 = vsel %vm630_vm3, 1.0, %v3970_v37  ;;  %v3019_v62 = vsel %vm631_vm4, 1.0, %v3970_v37  ;;  %v3024_v63 = vsel %vm644_vm5, 1.0, %v3970_v37 }
  0xf4   : > { %4038 = vst [vmem:[#allocation29_spill] sm:$0xff] %v3024_v63  ;;  %v3031_v3 = vsel %vm645_vm6, 1.0, %v3970_v37  ;;  %vm658_vm2 = vcmp.eq.s32.totalorder %v2915_v35, %v2931_v39  ;;  %v3050_v7 = vsel %vm656_vm10, 1.0, %v3970_v37  ;;  %v3056_v8 = vsel %vm657_vm11, 1.0, %v3970_v37 }
  0xf5   : > { %v464_v44 = vpop.f32.mrf.mxu3  ;;  %4039 = vst [vmem:[#allocation30_spill] sm:$0xff] %v3031_v3  ;;  %vm796_vm3 = vcmask 1045508   ;;  %v3073_v13 = vsel %vm646_vm9, 1.0, %v3970_v37  ;;  %v3082_v14 = vsel %vm658_vm2, 1.0, %v3970_v37  ;;  %vm799_vm2 = vcmask 1045509  }
  0xf6   : > { %v516_v59 = vadd.f32 %v510_v48, %v464_v44  ;;  %4041 = vst [vmem:[#allocation32_spill] sm:$0xff] %v3050_v7 }
  0xf7   : > { %4042 = vst [vmem:[#allocation33_spill] sm:$0xff] %v3056_v8 }
  0xf8   : > { %v2954_v46 = vpop.permute.xlu0 %546  ;;  %v3060_v9 = vrot.slane %v516_v59, 7  ;;  %4043 = vst [vmem:[#allocation34_spill] sm:$0xff] %v3073_v13 }
  0xf9   : > { %v3026_v2 = vpop.permute.xlu2 %605  ;;  %vm635_vm4 = vcmp.eq.s32.totalorder %v2905_v29, %v2954_v46  ;;  %vm636_vm5 = vcmp.eq.s32.totalorder %v2910_v33, %v2954_v46  ;;  %4044 = vst [vmem:[#allocation35_spill] sm:$0xff] %v3082_v14 }
  0xfa   : > { %vm662_vm6 = vcmp.eq.s32.totalorder %v2905_v29, %v3026_v2  ;;  %vm663_vm10 = vcmp.eq.s32.totalorder %v2910_v33, %v3026_v2  ;;  %v3088_v16 = vsel %vm635_vm4, 1.0, %v3970_v37  ;;  %v3094_v17 = vsel %vm636_vm5, 1.0, %v3970_v37 }
  0xfb   : > { %v3097_v18 = vsel %vm662_vm6, 1.0, %v3970_v37  ;;  %v3100_v19 = vsel %vm663_vm10, 1.0, %v3970_v37  ;;  %v776_v22 = vsel %vm775_vm1, %v3042_v6, %v3060_v9  ;;  %v780_v32 = vsel %vm779_vm8, %v3042_v6, %v3060_v9 }
  0xfc   : > { %4045 = vst [vmem:[#allocation36_spill] sm:$0xff] %v3097_v18  ;;  %vm789_vm1 = vcmask 1043459   ;;  %vm801_vm4 = vcmask 1046533   ;;  %vm4055_vm5 = vcmask 1044484   ;;  %vm791_vm6 = vcmask 1044483  }
  0xfd   : > { %v484_v0 = vpop.f32.mrf.mxu3  ;;  %4046 = vst [vmem:[#allocation37_spill] sm:$0xff] %v3100_v19  ;;  %vm4056_vm10 = vcmask 1043458  }
  0xfe   : > { %v517_v4 = vadd.f32 %v511_v55, %v484_v0 }
 0x100   : > { %v573_v10 = vpop.permute.xlu0 %572  ;;  %v599_v11 = vpop.permute.xlu1 %598  ;;  %v3068_v12 = vrot.slane %v517_v4, 6 }
 0x101   : > { %vm647_vm15 = vcmp.eq.s32.totalorder %v2905_v29, %v573_v10  ;;  %vm659_vm11 = vcmp.eq.s32.totalorder %v2905_v29, %v599_v11  ;;  %vm648_vm14 = vcmp.eq.s32.totalorder %v2910_v33, %v573_v10  ;;  %vm649_vm0 = vcmp.eq.s32.totalorder %v2915_v35, %v573_v10 }
 0x102   : > { %vm660_vm12 = vcmp.eq.s32.totalorder %v2910_v33, %v599_v11  ;;  %v3103_v20 = vsel %vm647_vm15, 1.0, %v3970_v37  ;;  %vm661_vm9 = vcmp.eq.s32.totalorder %v2915_v35, %v599_v11  ;;  %v3107_v21 = vsel %vm659_vm11, 1.0, %v3970_v37 }
 0x103   : > { %4047 = vst [vmem:[#allocation38_spill] sm:$0xff] %v3107_v21  ;;  %v3113_v23 = vsel %vm648_vm14, 1.0, %v3970_v37  ;;  %v3116_v24 = vsel %vm649_vm0, 1.0, %v3970_v37  ;;  %v3119_v25 = vsel %vm660_vm12, 1.0, %v3970_v37  ;;  %v778_v26 = vsel %vm777_vm7, %v776_v22, %v3068_v12 }
 0x104   : > { %4048 = vst [vmem:[#allocation39_spill] sm:$0xff] %v3116_v24  ;;  %v814_v27 = vperm.slane %v778_v26, 0  ;;  %v815_v28 = vperm.slane %v778_v26, 1  ;;  %v816_v31 = vperm.slane %v778_v26, 2  ;;  %v3127_v34 = vsel %vm661_vm9, 1.0, %v3970_v37 }
 0x105   : > { %4049 = vst [vmem:[#allocation40_spill] sm:$0xff] %v3119_v25  ;;  %vm664_vm0 = vcmp.eq.s32.totalorder %v2915_v35, %v3026_v2  ;;  %vm4051_vm12 = vcmask 1046528   ;;  %vm4052_vm7 = vcmask 1046534   ;;  %vm4053_vm14 = vcmask 1042433  }
 0x106   : > { %4050 = vst [vmem:[#allocation41_spill] sm:$0xff] %v3127_v34  ;;  %v3134_v36 = vsel %vm4051_vm12, %v3060_v9, %v3042_v6  ;;  %v805_v39 = vsel %vm4052_vm7, %v3042_v6, %v3060_v9  ;;  %v782_v41 = vsel %vm4053_vm14, %v780_v32, %v3068_v12  ;;  %v862_v44 = vmul.f32 %v2966_v50, %v814_v27 }
 0x107   : > { %v863_v47 = vmul.f32 %v2977_v53, %v815_v28  ;;  %v865_v48 = vmul.f32 %v3009_v60, %v814_v27  ;;  %vm4054_vm15 = vcmask 1042434   ;;  %v864_v59 = vmul.f32 %v2988_v56, %v816_v31 }
 0x108   : > { %v785_v55 = vsel %vm4054_vm15, %v3042_v6, %v3060_v9  ;;  %v866_v0 = vmul.f32 %v3014_v61, %v815_v28  ;;  %v867_v4 = vmul.f32 %v3019_v62, %v816_v31  ;;  %v795_v10 = vsel %vm4055_vm5, %v3042_v6, %v3060_v9 }
 0x109   : > { %v910_v11 = vadd.f32 %v863_v47, %v862_v44  ;;  %v914_v22 = vsel %vm806_vm13, %v865_v48, 0.0  ;;  %v3154_v26 = vrot.slane %v782_v41, 1  ;;  %v787_v27 = vsel %vm4056_vm10, %v785_v55, %v3068_v12 }
 0x10a   : > { %v915_v32 = vsel %vm806_vm13, %v866_v0, 0.0  ;;  %v917_v37 = vsel %vm806_vm13, %v867_v4, 0.0  ;;  %v3160_v28 = vrot.slane %v787_v27, 2  ;;  %v797_v31 = vsel %vm796_vm3, %v795_v10, %v3068_v12 }
 0x10b   : > { %v911_v56 = vadd.f32 %v910_v11, %v864_v59  ;;  %v916_v53 = vadd.f32 %v915_v32, %v914_v22  ;;  %v3975_v44 = vperm.slane %v3154_v26, 0  ;;  %v3974_v47 = vperm.slane %v3154_v26, 1 }
 0x10c   : > { %v3979_v41 = vperm.slane %v3154_v26, 2  ;;  %v820_v48 = vperm.slane %v3160_v28, 0  ;;  %v821_v55 = vperm.slane %v3160_v28, 1  ;;  %v822_v0 = vperm.slane %v3160_v28, 2 }
 0x10d   : > { %912 = vadd.xlane.f32.xlu2 %v911_v56  ;;  %v918_v4 = vadd.f32 %v917_v37, %v916_v53  ;;  %v868_v10 = vmul.f32 %v2982_v54, %v3975_v44  ;;  %v869_v59 = vmul.f32 %v2995_v57, %v3974_v47  ;;  %v3176_v11 = vrot.slane %v797_v31, 4  ;;  %v3185_v53 = vpop.permute.xlu1 %611 }
 0x10e   : > { %v807_v22 = vsel %vm806_vm13, %v3068_v12, %v805_v39  ;;  %v874_v27 = vmul.f32 %v2928_v38, %v820_v48  ;;  %v875_v32 = vmul.f32 %v2936_v40, %v821_v55  ;;  %v800_v37 = vsel %vm799_vm2, %v3042_v6, %v3060_v9 }
 0x10f   : > { %919 = vadd.xlane.f32.xlu1 %v918_v4  ;;  %v870_v56 = vmul.f32 %v2999_v58, %v3979_v41  ;;  %v921_v28 = vadd.f32 %v869_v59, %v868_v10  ;;  %v3981_v31 = vperm.slane %v3176_v11, 0  ;;  %v3980_v39 = vperm.slane %v3176_v11, 1 }
 0x110   : > { %vm811_vm3 = vcmask 1046529   ;;  %v876_v47 = vmul.f32 %v2971_v51, %v822_v0  ;;  %v932_v44 = vadd.f32 %v875_v32, %v874_v27  ;;  %v3982_v40 = vperm.slane %v3176_v11, 2 }
 0x111   : > { %v790_v38 = vsel %vm789_vm1, %v3042_v6, %v3060_v9  ;;  %v3197_v4 = vrot.slane %v807_v22, 6  ;;  %v922_v57 = vadd.f32 %v921_v28, %v870_v56  ;;  %v886_v10 = vmul.f32 %v2963_v49, %v3981_v31 }
 0x112   : > { %v4057_v59 = vmov 0.0   ;;  %vm665_vm11 = vcmp.eq.s32.totalorder %v2905_v29, %v3185_v53  ;;  %v933_v27 = vadd.f32 %v932_v44, %v876_v47  ;;  %v887_v6 = vmul.f32 %v2974_v52, %v3980_v39 }
 0x113   : > { %v3206_v41 = vsel %vm664_vm0, 1.0, %v4057_v59  ;;  %v802_v9 = vsel %vm801_vm4, %v800_v37, %v3068_v12  ;;  %923 = vadd.xlane.f32.xlu0 %v922_v57  ;;  %v792_v32 = vsel %vm791_vm6, %v790_v38, %v3068_v12  ;;  %v877_v2 = vmul.f32 %v2944_v42, %v820_v48 }
 0x114   : > { %4058 = vst [vmem:[#allocation42_spill] sm:$0xff] %v3206_v41  ;;  %v3215_v22 = vrot.slane %v802_v9, 5  ;;  %v878_v56 = vmul.f32 %v2947_v43, %v821_v55  ;;  %vm666_vm9 = vcmp.eq.s32.totalorder %v2910_v33, %v3185_v53  ;;  %v888_v44 = vmul.f32 %v3039_v5, %v3982_v40 }
 0x115   : > { %v954_v47 = vadd.f32 %v887_v6, %v886_v10  ;;  %v793_v28 = vrot.slane %v792_v32, 3  ;;  %v832_v57 = vperm.slane %v3197_v4, 0  ;;  %934 = vadd.xlane.f32.xlu2 %v933_v27  ;;  %vm637_vm0 = vcmp.eq.s32.totalorder %v2915_v35, %v2954_v46 }
 0x116   : > { %v829_v37 = vperm.slane %v3215_v22, 0  ;;  %v830_v38 = vperm.slane %v3215_v22, 1  ;;  %v831_v48 = vperm.slane %v3215_v22, 2  ;;  %v936_v6 = vsel %vm806_vm13, %v877_v2, 0.0 }
 0x117   : > { %v955_v55 = vadd.f32 %v954_v47, %v888_v44  ;;  %v823_v9 = vperm.slane %v793_v28, 0  ;;  %v824_v39 = vperm.slane %v793_v28, 1  ;;  %v825_v31 = vperm.slane %v793_v28, 2 }
 0x118   : > { %v892_v40 = vmul.f32 %v3050_v7, %v829_v37  ;;  %v893_v10 = vmul.f32 %v3056_v8, %v830_v38  ;;  %v937_v27 = vsel %vm806_vm13, %v878_v56, 0.0  ;;  %v833_v32 = vperm.slane %v3197_v4, 1 }
 0x119   : > { %956 = vadd.xlane.f32.xlu1 %v955_v55  ;;  %v880_v22 = vmul.f32 %v3024_v63, %v823_v9  ;;  %v881_v5 = vmul.f32 %v3031_v3, %v824_v39  ;;  %v879_v44 = vmul.f32 %v2951_v45, %v822_v0  ;;  %v894_v47 = vmul.f32 %v3082_v14, %v831_v48 }
 0x11a   : > { %v965_v28 = vadd.f32 %v893_v10, %v892_v40  ;;  %v883_v7 = vmul.f32 %v3103_v20, %v823_v9  ;;  %v884_v8 = vmul.f32 %v3113_v23, %v824_v39  ;;  %vm667_vm12 = vcmp.eq.s32.totalorder %v2915_v35, %v3185_v53 }
 0x11b   : > { %v882_v2 = vmul.f32 %v3073_v13, %v825_v31  ;;  %v943_v56 = vadd.f32 %v881_v5, %v880_v22  ;;  %v938_v55 = vadd.f32 %v937_v27, %v936_v6  ;;  %v812_v52 = vsel %vm811_vm3, %v3068_v12, %v3134_v36  ;;  %v619_v36 = vpop.permute.xlu1 %618 }
 0x11c   : > { %v3253_v40 = vsel %vm665_vm11, 1.0, %v4057_v59  ;;  %v966_v0 = vadd.f32 %v965_v28, %v894_v47  ;;  %v898_v39 = vmul.f32 %v3097_v18, %v832_v57  ;;  %v947_v10 = vsel %vm806_vm13, %v883_v7, 0.0 }
 0x11d   : > { %4059 = vst [vmem:[#allocation43_spill] sm:$0xff] %v3253_v40  ;;  %v944_v9 = vadd.f32 %v943_v56, %v882_v2  ;;  %v948_v14 = vsel %vm806_vm13, %v884_v8, 0.0  ;;  %v899_v5 = vmul.f32 %v3100_v19, %v833_v32  ;;  %vm653_vm7 = vcmp.eq.s32.totalorder %v2905_v29, %v2907_v30 }
 0x11e   : > { %vm654_vm14 = vcmp.eq.s32.totalorder %v2910_v33, %v2907_v30  ;;  %v3267_v12 = vsel %vm666_vm9, 1.0, %v4057_v59  ;;  %967 = vadd.xlane.f32.xlu0 %v966_v0  ;;  %v939_v7 = vsel %vm806_vm13, %v879_v44, 0.0  ;;  %v895_v8 = vmul.f32 %v3107_v21, %v829_v37 }
 0x11f   : > { %4060 = vst [vmem:[#allocation44_spill] sm:$0xff] %v3267_v12  ;;  %v896_v6 = vmul.f32 %v3119_v25, %v830_v38  ;;  %v3272_v27 = vrot.slane %v812_v52, 7  ;;  %945 = vadd.xlane.f32.xlu2 %v944_v9  ;;  %v940_v22 = vadd.f32 %v939_v7, %v938_v55  ;;  %v885_v47 = vmul.f32 %v3116_v24, %v825_v31 }
 0x120   : > { %v834_v28 = vperm.slane %v3197_v4, 2  ;;  %v901_v2 = vmul.f32 %v3253_v40, %v832_v57  ;;  %v949_v56 = vadd.f32 %v948_v14, %v947_v10  ;;  %v969_v19 = vsel %vm806_vm13, %v895_v8, 0.0 }
 0x121   : > { %v970_v0 = vsel %vm806_vm13, %v896_v6, 0.0  ;;  %v902_v44 = vmul.f32 %v3267_v12, %v833_v32  ;;  %vm668_vm15 = vcmp.eq.s32.totalorder %v2905_v29, %v619_v36  ;;  %vm669_vm4 = vcmp.eq.s32.totalorder %v2910_v33, %v619_v36  ;;  %941 = vadd.xlane.f32.xlu1 %v940_v22 }
 0x122   : > { %v976_v52 = vadd.f32 %v899_v5, %v898_v39  ;;  %v3286_v31 = vsel %vm637_vm0, 1.0, %v4057_v59  ;;  %v897_v14 = vmul.f32 %v3127_v34, %v831_v48  ;;  %v4061_v4 = vperm.slane %v3154_v26, 0 }
 0x123   : > { %v4062_v37 = vperm.slane %v3154_v26, 1  ;;  %v3299_v32 = vsel %vm667_vm12, 1.0, %v4057_v59  ;;  %v950_v46 = vsel %vm806_vm13, %v885_v47, 0.0  ;;  %v900_v55 = vmul.f32 %v3206_v41, %v834_v28 }
 0x124   : > { %v871_v57 = vmul.f32 %v3088_v16, %v4061_v4  ;;  %4063 = vst [vmem:[#allocation45_spill] sm:$0xff] %v3299_v32  ;;  %v971_v39 = vadd.f32 %v970_v0, %v969_v19  ;;  %v835_v48 = vperm.slane %v3272_v27, 0  ;;  %v3305_v9 = vsel %vm668_vm15, 1.0, %v4057_v59 }
 0x125   : > { %v872_v38 = vmul.f32 %v3094_v17, %v4062_v37  ;;  %4064 = vst [vmem:[#allocation46_spill] sm:$0xff] %v3305_v9  ;;  %v3308_v10 = vsel %vm669_vm4, 1.0, %v4057_v59  ;;  %v951_v5 = vadd.f32 %v950_v46, %v949_v56  ;;  %v836_v7 = vperm.slane %v3272_v27, 1 }
 0x126   : > { %4065 = vst [vmem:[#allocation47_spill] sm:$0xff] %v3308_v10  ;;  %v977_v8 = vadd.f32 %v976_v52, %v900_v55  ;;  %v980_v53 = vsel %vm806_vm13, %v901_v2, 0.0  ;;  %v981_v6 = vsel %vm806_vm13, %v902_v44, 0.0  ;;  %vm670_vm5 = vcmp.eq.s32.totalorder %v2915_v35, %v619_v36 }
 0x127   : > { %952 = vadd.xlane.f32.xlu0 %v951_v5  ;;  %v972_v19 = vsel %vm806_vm13, %v897_v14, 0.0  ;;  %v925_v22 = vsel %vm806_vm13, %v871_v57, 0.0  ;;  %v926_v47 = vsel %vm806_vm13, %v872_v38, 0.0  ;;  %v903_v56 = vmul.f32 %v3299_v32, %v834_v28  ;;  %v625_v57 = vpop.permute.xlu0 %624 }
 0x128   : > { %978 = vadd.xlane.f32.xlu2 %v977_v8  ;;  %v973_v0 = vadd.f32 %v972_v19, %v971_v39  ;;  %v904_v4 = vmul.f32 %v3305_v9, %v835_v48  ;;  %v905_v52 = vmul.f32 %v3308_v10, %v836_v7  ;;  %v982_v2 = vadd.f32 %v981_v6, %v980_v53 }
 0x129   : > { %v4066_v44 = vperm.slane %v3154_v26, 2  ;;  %v3327_v14 = vsel %vm653_vm7, 1.0, %v4057_v59  ;;  %v3333_v28 = vsel %vm654_vm14, 1.0, %v4057_v59  ;;  %v927_v38 = vadd.f32 %v926_v47, %v925_v22 }
 0x12a   : > { %4067 = vst [vmem:[#allocation48_spill] sm:$0xff] %v3327_v14  ;;  %974 = vadd.xlane.f32.xlu1 %v973_v0  ;;  %v3338_v26 = vsel %vm670_vm5, 1.0, %v4057_v59  ;;  %v4070_v46 = vperm.slane %v3176_v11, 0  ;;  %v4071_v39 = vperm.slane %v3176_v11, 1  ;;  %vm655_vm6 = vcmp.eq.s32.totalorder %v2915_v35, %v2907_v30 }
 0x12b   : > { %v873_v37 = vmul.f32 %v3286_v31, %v4066_v44  ;;  %4068 = vst [vmem:[#allocation49_spill] sm:$0xff] %v3333_v28  ;;  %v983_v8 = vsel %vm806_vm13, %v903_v56, 0.0  ;;  %v837_v53 = vperm.slane %v3272_v27, 2  ;;  %v987_v6 = vadd.f32 %v905_v52, %v904_v4 }
 0x12c   : > { %4069 = vst [vmem:[#allocation50_spill] sm:$0xff] %v3338_v26  ;;  %v889_v55 = vmul.f32 %v3327_v14, %v4070_v46  ;;  %v890_v5 = vmul.f32 %v3333_v28, %v4071_v39  ;;  %vm671_vm10 = vcmp.eq.s32.totalorder %v2905_v29, %v625_v57  ;;  %vm672_vm3 = vcmp.eq.s32.totalorder %v2910_v33, %v625_v57 }
 0x12d   : > { %v984_v36 = vadd.f32 %v983_v8, %v982_v2  ;;  %v928_v19 = vsel %vm806_vm13, %v873_v37, 0.0  ;;  %v906_v47 = vmul.f32 %v3338_v26, %v837_v53  ;;  %v3357_v56 = vsel %vm655_vm6, 1.0, %v4057_v59 }
 0x12e   : > { %v929_v22 = vadd.f32 %v928_v19, %v927_v38  ;;  %v958_v0 = vsel %vm806_vm13, %v889_v55, 0.0  ;;  %v959_v30 = vsel %vm806_vm13, %v890_v5, 0.0  ;;  %4072 = vst [vmem:[#allocation51_spill] sm:$0xff] %v3357_v56  ;;  %v3360_v27 = vsel %vm671_vm10, 1.0, %v4057_v59 }
 0x12f   : > { %985 = vadd.xlane.f32.xlu0 %v984_v36  ;;  %4073 = vst [vmem:[#allocation52_spill] sm:$0xff] %v3360_v27  ;;  %v3363_v4 = vsel %vm672_vm3, 1.0, %v4057_v59  ;;  %v988_v33 = vadd.f32 %v987_v6, %v906_v47  ;;  %v4075_v52 = vperm.slane %v3176_v11, 2  ;;  %v960_v44 = vadd.f32 %v959_v30, %v958_v0 }
 0x130   : > { %4074 = vst [vmem:[#allocation53_spill] sm:$0xff] %v3363_v4  ;;  %930 = vadd.xlane.f32.xlu2 %v929_v22  ;;  %vm673_vm11 = vcmp.eq.s32.totalorder %v2915_v35, %v625_v57  ;;  %v907_v37 = vmul.f32 %v3360_v27, %v835_v48  ;;  %v908_v38 = vmul.f32 %v3363_v4, %v836_v7  ;;  %vm1033_vm9 = vcmask 130112  }
 0x131   : > { %v891_v2 = vmul.f32 %v3357_v56, %v4075_v52  ;;  %v3373_v55 = vsel %vm673_vm11, 1.0, %v4057_v59  ;;  %vm4077_vm0 = vcmask 1042434   ;;  %vm4078_vm12 = vcmask 1044484  }
 0x132   : > { %989 = vadd.xlane.f32.xlu1 %v988_v33  ;;  %4076 = vst [vmem:[#allocation54_spill] sm:$0xff] %v3373_v55  ;;  %v991_v5 = vsel %vm806_vm13, %v907_v37, 0.0  ;;  %v992_v11 = vsel %vm806_vm13, %v908_v38, 0.0  ;;  %v909_v8 = vmul.f32 %v3373_v55, %v837_v53  ;;  %v3384_v37 = vadd.s32 4294967288, %v2905_v29  ;;  %vm4080_vm4 = vmmov %vm4077_vm0 }
 0x133   : > { %v961_v46 = vsel %vm806_vm13, %v891_v2, 0.0  ;;  %v993_v6 = vadd.f32 %v992_v11, %v991_v5  ;;  %vm1062_vm7 = vcmask 1047559   ;;  %vm1065_vm14 = vcmask 113664   ;;  %vm4081_vm5 = vmmov %vm4078_vm12 }
 0x134   : > { %v962_v39 = vadd.f32 %v961_v46, %v960_v44  ;;  %v994_v35 = vsel %vm806_vm13, %v909_v8, 0.0  ;;  %vm4079_vm15 = vcmask 1046534   ;;  %v2668_v14 = vmov 0  }
 0x135   : > { %v995_v57 = vadd.f32 %v994_v35, %v993_v6  ;;  %2335 = vset.pattern.permute.xlu2 %v2668_v14  ;;  %2336 = vset.pattern.permute.xlu0 %v2668_v14  ;;  %vm4082_vm6 = vmmov %vm4079_vm15 }
 0x136   : > { %2334 = vset.pattern.permute.xlu1 %v2668_v14 }
 0x138   : > { %963 = vadd.xlane.f32.xlu2 %v962_v39 }
 0x140   : > { %996 = vadd.xlane.f32.xlu2 %v995_v57 }
 0x180   : > { %v913_v48 = vpop.xlane.xlu2 %912 }
 0x181   : > { %2348 = vtanh.f32 %v913_v48 }
 0x182   : > { %v920_v7 = vpop.xlane.xlu1 %919 }
 0x183   : > { %2350 = vtanh.f32 %v920_v7 }
 0x186   : > { %v924_v19 = vpop.xlane.xlu0 %923 }
 0x187   : > { %2352 = vtanh.f32 %v924_v19  ;;  %v3379_v2 = vpop.eup %2348 }
 0x188   : > { %v935_v36 = vpop.xlane.xlu2 %934  ;;  %v1030_v39 = vperm.slane %v3379_v2, %v2905_v29 }
 0x189   : > { %v3381_v44 = vpop.eup %2350 }
 0x18a   : > { %v1032_v11 = vperm.slane %v3381_v44, %v3384_v37 }
 0x18c   : > { %v957_v22 = vpop.xlane.xlu1 %956 }
 0x18d   : > { %v3386_v38 = vpop.eup %2352 }
 0x18e   : > { %v1035_v8 = vperm.slane %v3386_v38, %v2905_v29 }
 0x191   : > { %v968_v47 = vpop.xlane.xlu0 %967 }
 0x192   : > { %v946_v59 = vpop.xlane.xlu2 %945 }
 0x194   : > { %v942_v0 = vpop.xlane.xlu1 %941 }
 0x19a   : > { %v953_v33 = vpop.xlane.xlu0 %952 }
 0x19b   : > { %v979_v30 = vpop.xlane.xlu2 %978 }
 0x19d   : > { %v975_v53 = vpop.xlane.xlu1 %974 }
 0x1a2   : > { %v986_v57 = vpop.xlane.xlu0 %985 }
 0x1a3   : > { %v931_v52 = vpop.xlane.xlu2 %930 }
 0x1a4   : > { %2354 = vtanh.f32 %v931_v52 }
 0x1a5   : > { %2356 = vtanh.f32 %v942_v0  ;;  %v990_v0 = vpop.xlane.xlu1 %989 }
 0x1a6   : > { %2358 = vtanh.f32 %v935_v36 }
 0x1a7   : > { %2360 = vtanh.f32 %v953_v33 }
 0x1a8   : > { %2362 = vtanh.f32 %v957_v22 }
 0x1a9   : > { %2364 = vtanh.f32 %v946_v59  ;;  %v1034_v59 = vsel %vm1033_vm9, %v1032_v11, %v1030_v39 }
 0x1aa   : > { %v3388_v46 = vpop.eup %2354  ;;  %2366 = vtanh.f32 %v975_v53 }
 0x1ab   : > { %v3392_v5 = vpop.eup %2356  ;;  %v1036_v6 = vperm.slane %v3388_v46, %v3384_v37  ;;  %v964_v35 = vpop.xlane.xlu2 %963 }
 0x1ac   : > { %2368 = vtanh.f32 %v964_v35  ;;  %v3400_v48 = vpop.eup %2358  ;;  %v1039_v19 = vperm.slane %v3392_v5, %v3384_v37 }
 0x1ad   : > { %v1037_v7 = vsel %vm1033_vm9, %v1036_v6, %v1035_v8  ;;  %v3403_v36 = vpop.eup %2360  ;;  %2370 = vtanh.f32 %v968_v47  ;;  %v1038_v52 = vperm.slane %v3400_v48, %v2905_v29 }
 0x1ae   : > { %v3407_v22 = vpop.eup %2362  ;;  %2372 = vtanh.f32 %v986_v57  ;;  %v1056_v53 = vsel %vm779_vm8, %v1037_v7, %v1034_v59  ;;  %v1042_v47 = vperm.slane %v3403_v36, %v3384_v37 }
 0x1af   : > { %v3410_v33 = vpop.eup %2364  ;;  %2374 = vtanh.f32 %v979_v30  ;;  %v1040_v35 = vsel %vm1033_vm9, %v1039_v19, %v1038_v52  ;;  %v1044_v39 = vperm.slane %v3407_v22, %v2905_v29 }
 0x1b0   : > { %v3415_v8 = vpop.eup %2366  ;;  %2376 = vtanh.f32 %v990_v0  ;;  %v1041_v11 = vperm.slane %v3410_v33, %v2905_v29  ;;  %v1057_v7 = vsel %vm4077_vm0, %v1040_v35, %v1056_v53 }
 0x1b1   : > { %v1048_v19 = vperm.slane %v3415_v8, %v3384_v37 }
 0x1b2   : > { %v2369_v6 = vpop.eup %2368  ;;  %v1043_v30 = vsel %vm1033_vm9, %v1042_v47, %v1041_v11 }
 0x1b3   : > { %v1045_v57 = vperm.slane %v2369_v6, %v3384_v37  ;;  %v997_v41 = vpop.xlane.xlu2 %996  ;;  %v3426_v59 = vpop.eup %2370  ;;  %v1058_v52 = vsel %vm789_vm1, %v1043_v30, %v1057_v7 }
 0x1b4   : > { %2378 = vtanh.f32 %v997_v41  ;;  %v3428_v18 = vpop.eup %2372  ;;  %v1047_v56 = vperm.slane %v3426_v59, %v2905_v29 }
 0x1b5   : > { %v1046_v0 = vsel %vm1033_vm9, %v1045_v57, %v1044_v39  ;;  %v2375_v49 = vpop.eup %2374  ;;  %v1051_v41 = vperm.slane %v3428_v18, %v3384_v37 }
 0x1b6   : > { %v1059_v53 = vsel %vm4078_vm12, %v1046_v0, %v1058_v52  ;;  %v3438_v35 = vpop.eup %2376  ;;  %v1049_v47 = vsel %vm1033_vm9, %v1048_v19, %v1047_v56  ;;  %v1050_v28 = vperm.slane %v2375_v49, %v2905_v29 }
 0x1b7   : > { %v1060_v39 = vsel %vm799_vm2, %v1049_v47, %v1059_v53  ;;  %v1053_v57 = vperm.slane %v3438_v35, %v2905_v29 }
 0x1b8   : > { %v1052_v30 = vsel %vm1033_vm9, %v1051_v41, %v1050_v28 }
 0x1b9   : > { %v1061_v52 = vsel %vm4079_vm15, %v1052_v30, %v1060_v39 }
 0x1ba   : > { %v2379_v11 = vpop.eup %2378 }
 0x1bb   : > { %v1054_v7 = vperm.slane %v2379_v11, %v3384_v37 }
 0x1bd   : > { %v1055_v0 = vsel %vm1033_vm9, %v1054_v7, %v1053_v57 }
 0x1be   : > { %v1063_v56 = vsel %vm1062_vm7, %v1055_v0, %v1061_v52 }
 0x1bf   : > { %v1066_v19 = vsel %vm1065_vm14, %v1063_v56, -inf }
 0x1c0   : > { %1067 = vmax.xlane.f32.xlu0 %v1066_v19 }
 0x233   : > { %v3453_v53 = vpop.xlane.xlu0 %1067 }
 0x234   : > { %v1071_v47 = vperm.slane %v3453_v53, 1  ;;  %v1070_v28 = vperm.slane %v3453_v53, 0  ;;  %v1074_v7 = vperm.slane %v3453_v53, 4  ;;  %v1072_v30 = vperm.slane %v3453_v53, 2 }
 0x236   : > { %v1088_v41 = vsub.f32 %v3386_v38, %v1071_v47  ;;  %v1087_v57 = vsub.f32 %v3381_v44, %v1070_v28  ;;  %v1086_v39 = vsub.f32 %v3379_v2, %v1070_v28  ;;  %v1095_v14 = vsub.f32 %v2369_v6, %v1074_v7 }
 0x237   : > { %v1090_v19 = vsub.f32 %v3400_v48, %v1072_v30  ;;  %v1089_v13 = vsub.f32 %v3388_v46, %v1071_v47  ;;  %v1076_v44 = vperm.slane %v3453_v53, 6  ;;  %v1073_v2 = vperm.slane %v3453_v53, 3 }
 0x238   : > { %v1106_v0 = vmul.f32 1.442695, %v1088_v41  ;;  %v1104_v52 = vmul.f32 1.442695, %v1087_v57  ;;  %v1102_v56 = vmul.f32 1.442695, %v1086_v39  ;;  %v1091_v47 = vsub.f32 %v3392_v5, %v1072_v30 }
 0x239   : > { %v1120_v38 = vmul.f32 1.442695, %v1095_v14  ;;  %v1110_v3 = vmul.f32 1.442695, %v1090_v19  ;;  %v1108_v63 = vmul.f32 1.442695, %v1089_v13  ;;  %v1098_v48 = vsub.f32 %v2375_v49, %v1076_v44 }
 0x23a   : > { %2380 = vpow2.f32 %v1106_v0  ;;  %v1092_v46 = vsub.f32 %v3410_v33, %v1073_v2  ;;  %v1077_v13 = vperm.slane %v3453_v53, 7  ;;  %v1093_v5 = vsub.f32 %v3403_v36, %v1073_v2 }
 0x23b   : > { %2382 = vpow2.f32 %v1104_v52  ;;  %v1126_v57 = vmul.f32 1.442695, %v1098_v48  ;;  %v1112_v52 = vmul.f32 1.442695, %v1091_v47  ;;  %v1075_v14 = vperm.slane %v3453_v53, 5 }
 0x23c   : > { %2384 = vpow2.f32 %v1102_v56  ;;  %v1114_v39 = vmul.f32 1.442695, %v1092_v46 }
 0x23d   : > { %2386 = vpow2.f32 %v1120_v38  ;;  %v1116_v38 = vmul.f32 1.442695, %v1093_v5  ;;  %v1097_v36 = vsub.f32 %v3415_v8, %v1075_v14  ;;  %v1100_v8 = vsub.f32 %v3438_v35, %v1077_v13 }
 0x23e   : > { %2388 = vpow2.f32 %v1110_v3  ;;  %v1101_v3 = vsub.f32 %v2379_v11, %v1077_v13 }
 0x23f   : > { %2390 = vpow2.f32 %v1108_v63  ;;  %v1094_v63 = vsub.f32 %v3407_v22, %v1074_v7  ;;  %v1096_v22 = vsub.f32 %v3426_v59, %v1075_v14  ;;  %v1124_v53 = vmul.f32 1.442695, %v1097_v36 }
 0x240   : > { %v3466_v28 = vpop.eup %2380  ;;  %2392 = vpow2.f32 %v1126_v57  ;;  %v1132_v33 = vmul.f32 1.442695, %v1101_v3  ;;  %v1099_v59 = vsub.f32 %v3428_v18, %v1076_v44  ;;  %v1130_v57 = vmul.f32 1.442695, %v1100_v8 }
 0x241   : > { %v3468_v41 = vpop.eup %2382  ;;  %1157 = vperm.xlu0 %2336, %v3466_v28   ;;  %2394 = vpow2.f32 %v1114_v39  ;;  %v1118_v30 = vmul.f32 1.442695, %v1094_v63  ;;  %v1122_v2 = vmul.f32 1.442695, %v1096_v22 }
 0x242   : > { %v3471_v6 = vpop.eup %2384  ;;  %1154 = vperm.xlu2 %2335, %v3468_v41   ;;  %2396 = vpow2.f32 %v1112_v52  ;;  %v1128_v39 = vmul.f32 1.442695, %v1099_v59 }
 0x243   : > { %1151 = vperm.xlu1 %2334, %v3471_v6   ;;  %v3478_v0 = vpop.eup %2386  ;;  %2398 = vpow2.f32 %v1132_v33 }
 0x244   : > { %v3480_v56 = vpop.eup %2388  ;;  %2400 = vpow2.f32 %v1118_v30 }
 0x245   : > { %v3483_v49 = vpop.eup %2390  ;;  %2402 = vpow2.f32 %v1116_v38 }
 0x246   : > { %v3490_v19 = vpop.eup %2392  ;;  %2404 = vpow2.f32 %v1124_v53 }
 0x247   : > { %v3492_v48 = vpop.eup %2394  ;;  %2406 = vpow2.f32 %v1122_v2 }
 0x248   : > { %v3495_v11 = vpop.eup %2396  ;;  %2408 = vpow2.f32 %v1130_v57 }
 0x249   : > { %1178 = vperm.xlu0 %2336, %v3478_v0   ;;  %v3501_v7 = vpop.eup %2398  ;;  %2410 = vpow2.f32 %v1128_v39 }
 0x24a   : > { %1163 = vperm.xlu2 %2335, %v3480_v56   ;;  %v3503_v46 = vpop.eup %2400 }
 0x24b   : > { %1160 = vperm.xlu1 %2334, %v3483_v49   ;;  %v3506_v47 = vpop.eup %2402 }
 0x24c   : > { %v3512_v52 = vpop.eup %2404 }
 0x24d   : > { %v3514_v3 = vpop.eup %2406 }
 0x24e   : > { %v3518_v63 = vpop.eup %2408 }
 0x24f   : > { %v3520_v5 = vpop.eup %2410 }
 0x251   : > { %1187 = vperm.xlu0 %2336, %v3490_v19  }
 0x252   : > { %1169 = vperm.xlu2 %2335, %v3492_v48  }
 0x253   : > { %1166 = vperm.xlu1 %2334, %v3495_v11  }
 0x259   : > { %1196 = vperm.xlu0 %2336, %v3501_v7  }
 0x25a   : > { %1175 = vperm.xlu2 %2335, %v3503_v46  }
 0x25b   : > { %1172 = vperm.xlu1 %2334, %v3506_v47  }
 0x262   : > { %1184 = vperm.xlu2 %2335, %v3512_v52  }
 0x263   : > { %1181 = vperm.xlu1 %2334, %v3514_v3  }
 0x26a   : > { %1193 = vperm.xlu2 %2335, %v3518_v63  }
 0x26b   : > { %1190 = vperm.xlu1 %2334, %v3520_v5  }
 0x29c   : > { %v1155_v18 = vpop.permute.xlu2 %1154 }
 0x29d   : > { %v1199_v26 = vperm.slane %v1155_v18, %v3384_v37 }
 0x2a4   : > { %v1164_v35 = vpop.permute.xlu2 %1163 }
 0x2a5   : > { %v1204_v40 = vperm.slane %v1164_v35, %v2905_v29 }
 0x2ac   : > { %v1170_v30 = vpop.permute.xlu2 %1169 }
 0x2ad   : > { %v1207_v55 = vperm.slane %v1170_v30, %v2905_v29 }
 0x2b3   : > { %v1158_v13 = vpop.permute.xlu0 %1157 }
 0x2b4   : > { %v1176_v36 = vpop.permute.xlu2 %1175  ;;  %v1201_v57 = vperm.slane %v1158_v13, %v2905_v29 }
 0x2b5   : > { %v1152_v44 = vpop.permute.xlu1 %1151  ;;  %v1210_v30 = vperm.slane %v1176_v36, %v2905_v29 }
 0x2b6   : > { %v1198_v39 = vperm.slane %v1152_v44, %v2905_v29 }
 0x2bb   : > { %v1179_v38 = vpop.permute.xlu0 %1178 }
 0x2bc   : > { %v1185_v2 = vpop.permute.xlu2 %1184  ;;  %v1211_v44 = vperm.slane %v1179_v38, %v3384_v37 }
 0x2bd   : > { %v1161_v33 = vpop.permute.xlu1 %1160  ;;  %v1214_v35 = vperm.slane %v1185_v2, %v3384_v37 }
 0x2be   : > { %v1202_v8 = vperm.slane %v1161_v33, %v3384_v37  ;;  %v1200_v33 = vsel %vm1033_vm9, %v1199_v26, %v1198_v39 }
 0x2c0   : > { %v1203_v10 = vsel %vm1033_vm9, %v1202_v8, %v1201_v57 }
 0x2c3   : > { %v1188_v53 = vpop.permute.xlu0 %1187 }
 0x2c4   : > { %v1194_v8 = vpop.permute.xlu2 %1193  ;;  %v1216_v38 = vperm.slane %v1188_v53, %v2905_v29 }
 0x2c5   : > { %v1167_v14 = vpop.permute.xlu1 %1166  ;;  %v1219_v2 = vperm.slane %v1194_v8, %v2905_v29 }
 0x2c6   : > { %v1205_v59 = vperm.slane %v1167_v14, %v3384_v37 }
 0x2c8   : > { %v1206_v4 = vsel %vm1033_vm9, %v1205_v59, %v1204_v40 }
 0x2cb   : > { %v1197_v34 = vpop.permute.xlu0 %1196 }
 0x2cc   : > { %v1220_v26 = vperm.slane %v1197_v34, %v3384_v37 }
 0x2cd   : > { %v1173_v22 = vpop.permute.xlu1 %1172 }
 0x2ce   : > { %v1208_v32 = vperm.slane %v1173_v22, %v3384_v37  ;;  %v1222_v22 = vsel %vm779_vm8, %v1203_v10, %v1200_v33  ;;  %v1221_v57 = vsel %vm1033_vm9, %v1220_v26, %v1219_v2 }
 0x2cf   : > { %v1223_v18 = vsel %vm4080_vm4, %v1206_v4, %v1222_v22 }
 0x2d0   : > { %v1209_v14 = vsel %vm1033_vm9, %v1208_v32, %v1207_v55 }
 0x2d1   : > { %v1224_v40 = vsel %vm789_vm1, %v1209_v14, %v1223_v18 }
 0x2d5   : > { %v1182_v12 = vpop.permute.xlu1 %1181 }
 0x2d6   : > { %v1213_v13 = vperm.slane %v1182_v12, %v2905_v29  ;;  %v1212_v12 = vsel %vm1033_vm9, %v1211_v44, %v1210_v30 }
 0x2d7   : > { %v1225_v4 = vsel %vm4081_vm5, %v1212_v12, %v1224_v40 }
 0x2d8   : > { %v1215_v32 = vsel %vm1033_vm9, %v1214_v35, %v1213_v13 }
 0x2d9   : > { %v1226_v59 = vsel %vm799_vm2, %v1215_v32, %v1225_v4 }
 0x2dd   : > { %v1191_v55 = vpop.permute.xlu1 %1190 }
 0x2de   : > { %v1217_v10 = vperm.slane %v1191_v55, %v3384_v37 }
 0x2e0   : > { %v1218_v36 = vsel %vm1033_vm9, %v1217_v10, %v1216_v38 }
 0x2e1   : > { %v1227_v34 = vsel %vm4082_vm6, %v1218_v36, %v1226_v59 }
 0x2e2   : > { %v1228_v39 = vsel %vm1062_vm7, %v1221_v57, %v1227_v34 }
 0x2e3   : > { %v1230_v33 = vsel %vm1065_vm14, %v1228_v39, 0.0 }
 0x2e4   : > { %1231 = vadd.xlane.f32.xlu1 %v1230_v33 }
 0x357   : > { %v3556_v53 = vpop.xlane.xlu1 %1231 }
 0x358   : > { %v1234_v14 = vperm.slane %v3556_v53, 0  ;;  %v1235_v13 = vperm.slane %v3556_v53, 1  ;;  %v3561_v44 = vperm.slane %v3556_v53, 2  ;;  %v1239_v22 = vperm.slane %v3556_v53, 5 }
 0x359   : > { %v3566_v18 = vperm.slane %v3556_v53, 3  ;;  %v3574_v57 = vperm.slane %v3556_v53, 4 }
 0x35a   : > { %2412 = vrcp.f32 %v1234_v14  ;;  %v1259_v55 = vand.u32 2147483647, %v1234_v14  ;;  %v1261_v12 = vand.u32 2147483648, %v1234_v14  ;;  %v1339_v34 = vand.u32 2147483647, %v1239_v22 }
 0x35b   : > { %2414 = vrcp.f32 %v1235_v13  ;;  %vm1255_vm3 = vweird.f32 %v1234_v14  ;;  %v1277_v24 = vand.u32 2147483648, %v1235_v13  ;;  %vm1271_vm4 = vweird.f32 %v1235_v13 }
 0x35c   : > { %2416 = vrcp.f32 %v3561_v44  ;;  %vm1260_vm0 = vcmp.eq.f32.partialorder %v1259_v55, 8.507059e+37  ;;  %v1262_v25 = vor.u32 1.1754944e-38, %v1261_v12  ;;  %vm1335_vm5 = vweird.f32 %v1239_v22 }
 0x35d   : > { %2418 = vrcp.f32 %v1239_v22 }
 0x35e   : > { %2420 = vrcp.f32 %v3566_v18 }
 0x35f   : > { %2422 = vrcp.f32 %v3574_v57 }
 0x360   : > { %v2413_v35 = vpop.eup %2412 }
 0x361   : > { %v2415_v30 = vpop.eup %2414  ;;  %v1251_v8 = vmul.f32 %v2413_v35, %v1234_v14  ;;  %vm1256_vm10 = vweird.f32 %v2413_v35  ;;  %v1275_v14 = vand.u32 2147483647, %v1235_v13 }
 0x362   : > { %v3568_v40 = vpop.eup %2416  ;;  %v1267_v26 = vmul.f32 %v2415_v30, %v1235_v13  ;;  %vm1257_vm11 = vmor %vm1255_vm3, %vm1256_vm10  ;;  %vm1272_vm12 = vweird.f32 %v2415_v30  ;;  %vm1340_vm3 = vcmp.eq.f32.partialorder %v1339_v34, 8.507059e+37 }
 0x363   : > { %v1252_v32 = vsub.f32 1.0, %v1251_v8  ;;  %v2419_v10 = vpop.eup %2418  ;;  %v1283_v4 = vmul.f32 %v3568_v40, %v3561_v44  ;;  %v1341_v8 = vand.u32 2147483648, %v1239_v22  ;;  %vm3581_vm6 = vmor %vm1271_vm4, %vm1272_vm12  ;;  %vm1287_vm12 = vweird.f32 %v3561_v44 }
 0x364   : > { %v1268_v38 = vsub.f32 1.0, %v1267_v26  ;;  %v1331_v36 = vmul.f32 %v2419_v10, %v1239_v22  ;;  %v3576_v9 = vpop.eup %2420  ;;  %vm1336_vm15 = vweird.f32 %v2419_v10 }
 0x365   : > { %v1253_v2 = vmul.f32 %v2413_v35, %v1252_v32  ;;  %v1284_v32 = vsub.f32 1.0, %v1283_v4  ;;  %vm1337_vm10 = vmor %vm1335_vm5, %vm1336_vm15  ;;  %v1342_v12 = vor.u32 1.1754944e-38, %v1341_v8  ;;  %v3593_v4 = vperm.slane %v3556_v53, 6 }
 0x366   : > { %v1269_v59 = vmul.f32 %v2415_v30, %v1268_v38  ;;  %v1332_v33 = vsub.f32 1.0, %v1331_v36  ;;  %vm1304_vm5 = vweird.f32 %v3576_v9 }
 0x367   : > { %v1254_v39 = vadd.f32 %v2413_v35, %v1253_v2  ;;  %2424 = vrcp.f32 %v3593_v4 }
 0x368   : > { %v1270_v21 = vadd.f32 %v2415_v30, %v1269_v59  ;;  %v1333_v27 = vmul.f32 %v2419_v10, %v1332_v33  ;;  %v2423_v59 = vpop.eup %2422 }
 0x369   : > { %v1258_v26 = vsel %vm1257_vm11, %v2413_v35, %v1254_v39  ;;  %vm1276_vm11 = vcmp.eq.f32.partialorder %v1275_v14, 8.507059e+37  ;;  %v1291_v39 = vand.u32 2147483647, %v3561_v44  ;;  %v1315_v8 = vmul.f32 %v2423_v59, %v3574_v57 }
 0x36a   : > { %v1263_v38 = vsel %vm1260_vm0, %v1262_v25, %v1258_v26  ;;  %v1334_v55 = vadd.f32 %v2419_v10, %v1333_v27  ;;  %v1274_v25 = vsel %vm3581_vm6, %v2415_v30, %v1270_v21  ;;  %v1278_v27 = vor.u32 1.1754944e-38, %v1277_v24 }
 0x36b   : > { %v1265_v51 = vmul.f32 %v3468_v41, %v1263_v38  ;;  %v1264_v2 = vmul.f32 %v3471_v6, %v1263_v38  ;;  %v1285_v41 = vmul.f32 %v3568_v40, %v1284_v32  ;;  %v1299_v6 = vmul.f32 %v3576_v9, %v3566_v18 }
 0x36c   : > { %v1338_v13 = vsel %vm1337_vm10, %v2419_v10, %v1334_v55  ;;  %v1279_v36 = vsel %vm1276_vm11, %v1278_v27, %v1274_v25  ;;  %vm1288_vm0 = vweird.f32 %v3568_v40  ;;  %v1293_v10 = vand.u32 2147483648, %v3561_v44 }
 0x36d   : > { %1398 = vperm.xlu0 %2336, %v1265_v51   ;;  %1395 = vperm.xlu2 %2335, %v1264_v2   ;;  %v3590_v22 = vsel %vm1340_vm3, %v1342_v12, %v1338_v13  ;;  %v1286_v21 = vadd.f32 %v3568_v40, %v1285_v41  ;;  %v1300_v30 = vsub.f32 1.0, %v1299_v6  ;;  %v1281_v24 = vmul.f32 %v3483_v49, %v1279_v36  ;;  %vm1289_vm15 = vmor %vm1287_vm12, %vm1288_vm0  ;;  %v2425_v38 = vpop.eup %2424 }
 0x36e   : > { %v1344_v51 = vmul.f32 %v3514_v3, %v3590_v22  ;;  %v1280_v34 = vmul.f32 %v3466_v28, %v1279_v36  ;;  %v1294_v26 = vor.u32 1.1754944e-38, %v1293_v10  ;;  %vm1292_vm4 = vcmp.eq.f32.partialorder %v1291_v39, 8.507059e+37 }
 0x36f   : > { %v1290_v3 = vsel %vm1289_vm15, %v3568_v40, %v1286_v21  ;;  %v1301_v33 = vmul.f32 %v3576_v9, %v1300_v30  ;;  %v3609_v49 = vperm.slane %v3556_v53, 7  ;;  %v1316_v44 = vsub.f32 1.0, %v1315_v8 }
 0x370   : > { %1425 = vperm.xlu1 %2334, %v1344_v51   ;;  %v1295_v28 = vsel %vm1292_vm4, %v1294_v26, %v1290_v3  ;;  %v1309_v2 = vand.u32 2147483648, %v3566_v18  ;;  %vm1303_vm6 = vweird.f32 %v3566_v18  ;;  %v1307_v53 = vand.u32 2147483647, %v3566_v18 }
 0x371   : > { %v1302_v32 = vadd.f32 %v3576_v9, %v1301_v33  ;;  %v1297_v40 = vmul.f32 %v3495_v11, %v1295_v28  ;;  %v1296_v14 = vmul.f32 %v3480_v56, %v1295_v28  ;;  %2426 = vrcp.f32 %v3609_v49  ;;  %vm1305_vm10 = vmor %vm1303_vm6, %vm1304_vm5 }
 0x372   : > { %v1317_v35 = vmul.f32 %v2423_v59, %v1316_v44  ;;  %v1347_v12 = vmul.f32 %v2425_v38, %v3593_v4  ;;  %v1310_v25 = vor.u32 1.1754944e-38, %v1309_v2  ;;  %vm1308_vm3 = vcmp.eq.f32.partialorder %v1307_v53, 8.507059e+37 }
 0x373   : > { %v1306_v55 = vsel %vm1305_vm10, %v3576_v9, %v1302_v32  ;;  %vm1320_vm11 = vweird.f32 %v2423_v59  ;;  %v1325_v13 = vand.u32 2147483648, %v3574_v57  ;;  %vm1319_vm0 = vweird.f32 %v3574_v57 }
 0x374   : > { %v1311_v41 = vsel %vm1308_vm3, %v1310_v25, %v1306_v55  ;;  %v1318_v11 = vadd.f32 %v2423_v59, %v1317_v35  ;;  %v1348_v56 = vsub.f32 1.0, %v1347_v12  ;;  %v1323_v9 = vand.u32 2147483647, %v3574_v57  ;;  %vm1321_vm12 = vmor %vm1319_vm0, %vm1320_vm11 }
 0x375   : > { %1404 = vperm.xlu0 %2336, %v1281_v24   ;;  %1401 = vperm.xlu2 %2335, %v1280_v34   ;;  %v1313_v18 = vmul.f32 %v3506_v47, %v1311_v41  ;;  %v1312_v27 = vmul.f32 %v3492_v48, %v1311_v41  ;;  %v1326_v30 = vor.u32 1.1754944e-38, %v1325_v13  ;;  %vm1352_vm4 = vweird.f32 %v2425_v38 }
 0x376   : > { %v1322_v51 = vsel %vm1321_vm12, %v2423_v59, %v1318_v11  ;;  %v1349_v36 = vmul.f32 %v2425_v38, %v1348_v56  ;;  %vm1324_vm15 = vcmp.eq.f32.partialorder %v1323_v9, 8.507059e+37  ;;  %v1357_v47 = vand.u32 2147483648, %v3593_v4 }
 0x377   : > { %v2427_v6 = vpop.eup %2426  ;;  %v1327_v10 = vsel %vm1324_vm15, %v1326_v30, %v1322_v51  ;;  %vm1351_vm5 = vweird.f32 %v3593_v4  ;;  %v1355_v57 = vand.u32 2147483647, %v3593_v4  ;;  %v1373_v28 = vand.u32 2147483648, %v3609_v49 }
 0x378   : > { %2341 = vset.pattern.permute.xlu1 %v2893_v15  ;;  %v1363_v21 = vmul.f32 %v2427_v6, %v3609_v49  ;;  %v1350_v24 = vadd.f32 %v2425_v38, %v1349_v36  ;;  %v1329_v48 = vmul.f32 %v3478_v0, %v1327_v10  ;;  %v1328_v39 = vmul.f32 %v3503_v46, %v1327_v10  ;;  %vm1353_vm6 = vmor %vm1351_vm5, %vm1352_vm4 }
 0x379   : > { %v1358_v33 = vor.u32 1.1754944e-38, %v1357_v47  ;;  %vm1356_vm10 = vcmp.eq.f32.partialorder %v1355_v57, 8.507059e+37  ;;  %vm1368_vm3 = vweird.f32 %v2427_v6  ;;  %v1345_v46 = vmul.f32 %v3512_v52, %v3590_v22 }
 0x37a   : > { %v1364_v34 = vsub.f32 1.0, %v1363_v21  ;;  %v1354_v59 = vsel %vm1353_vm6, %v2425_v38, %v1350_v24  ;;  %vm1367_vm11 = vweird.f32 %v3609_v49  ;;  %v1371_v4 = vand.u32 2147483647, %v3609_v49 }
 0x37b   : > { %v1359_v8 = vsel %vm1356_vm10, %v1358_v33, %v1354_v59  ;;  %vm1369_vm0 = vmor %vm1367_vm11, %vm1368_vm3  ;;  %v1374_v44 = vor.u32 1.1754944e-38, %v1373_v28  ;;  %vm4085_vm15 = vcmask 1042434   ;;  %vm4086_vm4 = vcmask 1044484  }
 0x37c   : > { %v1365_v3 = vmul.f32 %v2427_v6, %v1364_v34  ;;  %v1360_v0 = vmul.f32 %v3490_v19, %v1359_v8  ;;  %vm1372_vm12 = vcmp.eq.f32.partialorder %v1371_v4, 8.507059e+37  ;;  %vm4087_vm5 = vcmask 1046534  }
 0x37d   : > { %1410 = vperm.xlu0 %2336, %v1297_v40   ;;  %1407 = vperm.xlu2 %2335, %v1296_v14   ;;  %v1361_v40 = vmul.f32 %v3520_v5, %v1359_v8  ;;  %vm4119_vm11 = vcmask 261120  }
 0x37e   : > { %v1366_v26 = vadd.f32 %v2427_v6, %v1365_v3 }
 0x380   : > { %v1370_v32 = vsel %vm1369_vm0, %v2427_v6, %v1366_v26  ;;  %vm4126_vm0 = vmmov %vm4086_vm4 }
 0x381   : > { %v1375_v38 = vsel %vm1372_vm12, %v1374_v44, %v1370_v32  ;;  %vm4127_vm12 = vmmov %vm4126_vm0 }
 0x382   : > { %v1376_v2 = vmul.f32 %v3518_v63, %v1375_v38  ;;  %v1377_v19 = vmul.f32 %v3501_v7, %v1375_v38 }
 0x385   : > { %1416 = vperm.xlu0 %2336, %v1313_v18   ;;  %1413 = vperm.xlu2 %2335, %v1312_v27  }
 0x38d   : > { %1422 = vperm.xlu0 %2336, %v1329_v48   ;;  %1419 = vperm.xlu2 %2335, %v1328_v39  }
 0x395   : > { %1431 = vperm.xlu0 %2336, %v1360_v0   ;;  %1428 = vperm.xlu2 %2335, %v1345_v46  }
 0x39d   : > { %1437 = vperm.xlu0 %2336, %v1376_v2   ;;  %1434 = vperm.xlu2 %2335, %v1361_v40   ;;  %v406_v2 = vld [vmem:[%s352_s1] sm:$0xff] }
 0x3a5   : > { %1440 = vperm.xlu2 %2335, %v1377_v19   ;;  %2340 = vset.pattern.permute.xlu0 %v2884_v1 }
 0x3ad   : > { %2337 = vset.pattern.permute.xlu2 %v2893_v15 }
 0x3c7   : > { %v1396_v52 = vpop.permute.xlu2 %1395 }
 0x3c8   : > { %v1442_v51 = vperm.slane %v1396_v52, %v2905_v29 }
 0x3cf   : > { %v1402_v22 = vpop.permute.xlu2 %1401 }
 0x3d0   : > { %v1445_v56 = vperm.slane %v1402_v22, %v2905_v29 }
 0x3d7   : > { %v1408_v49 = vpop.permute.xlu2 %1407 }
 0x3d8   : > { %v1448_v18 = vperm.slane %v1408_v49, %v2905_v29 }
 0x3df   : > { %v1399_v14 = vpop.permute.xlu0 %1398  ;;  %v1414_v53 = vpop.permute.xlu2 %1413 }
 0x3e0   : > { %v1443_v6 = vperm.slane %v1399_v14, %v3384_v37  ;;  %v1451_v36 = vperm.slane %v1414_v53, %v2905_v29 }
 0x3e2   : > { %v1444_v24 = vsel %vm1033_vm9, %v1443_v6, %v1442_v51  ;;  %v1426_v47 = vpop.permute.xlu1 %1425 }
 0x3e3   : > { %v1457_v28 = vperm.slane %v1426_v47, %v2905_v29 }
 0x3e7   : > { %v1405_v55 = vpop.permute.xlu0 %1404  ;;  %v1420_v35 = vpop.permute.xlu2 %1419 }
 0x3e8   : > { %v1446_v11 = vperm.slane %v1405_v55, %v3384_v37  ;;  %v1454_v30 = vperm.slane %v1420_v35, %v2905_v29 }
 0x3ea   : > { %v1447_v21 = vsel %vm1033_vm9, %v1446_v11, %v1445_v56 }
 0x3eb   : > { %v1466_v48 = vsel %vm779_vm8, %v1447_v21, %v1444_v24 }
 0x3ef   : > { %v1411_v12 = vpop.permute.xlu0 %1410  ;;  %v1429_v25 = vpop.permute.xlu2 %1428 }
 0x3f0   : > { %v1449_v7 = vperm.slane %v1411_v12, %v3384_v37  ;;  %v1458_v3 = vperm.slane %v1429_v25, %v3384_v37 }
 0x3f2   : > { %v1450_v10 = vsel %vm1033_vm9, %v1449_v7, %v1448_v18  ;;  %v1459_v32 = vsel %vm1033_vm9, %v1458_v3, %v1457_v28 }
 0x3f3   : > { %v1467_v59 = vsel %vm4085_vm15, %v1450_v10, %v1466_v48 }
 0x3f7   : > { %v1417_v63 = vpop.permute.xlu0 %1416  ;;  %v1435_v41 = vpop.permute.xlu2 %1434 }
 0x3f8   : > { %v1452_v13 = vperm.slane %v1417_v63, %v3384_v37  ;;  %v1461_v8 = vperm.slane %v1435_v41, %v3384_v37 }
 0x3fa   : > { %v1453_v34 = vsel %vm1033_vm9, %v1452_v13, %v1451_v36 }
 0x3fb   : > { %v1468_v33 = vsel %vm789_vm1, %v1453_v34, %v1467_v59 }
 0x3ff   : > { %v1423_v5 = vpop.permute.xlu0 %1422  ;;  %v1441_v26 = vpop.permute.xlu2 %1440 }
 0x400   : > { %v1455_v27 = vperm.slane %v1423_v5, %v3384_v37  ;;  %v1464_v44 = vperm.slane %v1441_v26, %v3384_v37  ;;  %v4088_v26 = vld [vmem:[#allocation26_spill] sm:$0xff] }
 0x402   : > { %v1456_v39 = vsel %vm1033_vm9, %v1455_v27, %v1454_v30 }
 0x403   : > { %v1469_v0 = vsel %vm4086_vm4, %v1456_v39, %v1468_v33  ;;  %vm4129_vm4 = vmmov %vm4087_vm5 }
 0x404   : > { %v1470_v40 = vsel %vm799_vm2, %v1459_v32, %v1469_v0  ;;  %v4089_v0 = vld [vmem:[#allocation27_spill] sm:$0xff] }
 0x407   : > { %v1432_v9 = vpop.permute.xlu0 %1431 }
 0x408   : > { %v1460_v57 = vperm.slane %v1432_v9, %v2905_v29 }
 0x40a   : > { %v1462_v46 = vsel %vm1033_vm9, %v1461_v8, %v1460_v57 }
 0x40b   : > { %v1471_v52 = vsel %vm4087_vm5, %v1462_v46, %v1470_v40  ;;  %v4090_v40 = vld [vmem:[#allocation28_spill] sm:$0xff]  ;;  %vm4130_vm5 = vmmov %vm4129_vm4 }
 0x40f   : > { %v1438_v4 = vpop.permute.xlu0 %1437 }
 0x410   : > { %v1463_v38 = vperm.slane %v1438_v4, %v2905_v29 }
 0x412   : > { %v1465_v19 = vsel %vm1033_vm9, %v1464_v44, %v1463_v38 }
 0x413   : > { %v1472_v22 = vsel %vm1062_vm7, %v1465_v19, %v1471_v52 }
 0x414   : > { %v1474_v49 = vmul.f32 %v1472_v22, %v406_v2 }
 0x416   : > { %v1475_v14 = vsel %vm1065_vm14, %v1474_v49, -inf }
 0x417   : > { %1476 = vmax.xlane.f32.xlu0 %v1475_v14 }
 0x48a   : > { %v1477_v53 = vpop.xlane.xlu0 %1476 }
 0x48b   : > { %v1478_v55 = vsub.f32 %v1474_v49, %v1477_v53 }
 0x48d   : > { %v1479_v35 = vmul.f32 1.442695, %v1478_v55 }
 0x48f   : > { %2428 = vpow2.f32 %v1479_v35 }
 0x495   : > { %v2429_v37 = vpop.eup %2428 }
 0x496   : > { %v1481_v29 = vsel %vm1065_vm14, %v2429_v37, 0.0 }
 0x497   : > { %1482 = vadd.xlane.f32.xlu1 %v1481_v29 }
 0x50a   : > { %v1483_v12 = vpop.xlane.xlu1 %1482 }
 0x50b   : > { %2430 = vrcp.f32 %v1483_v12  ;;  %v1495_v41 = vand.u32 2147483648, %v1483_v12  ;;  %v1493_v7 = vand.u32 2147483647, %v1483_v12  ;;  %vm1489_vm6 = vweird.f32 %v1483_v12 }
 0x50d   : > { %v1496_v6 = vor.u32 1.1754944e-38, %v1495_v41  ;;  %vm1494_vm3 = vcmp.eq.f32.partialorder %v1493_v7, 8.507059e+37 }
 0x511   : > { %v2431_v63 = vpop.eup %2430 }
 0x512   : > { %v1485_v25 = vmul.f32 %v2431_v63, %v1483_v12  ;;  %vm1490_vm9 = vweird.f32 %v2431_v63 }
 0x513   : > { %vm1491_vm10 = vmor %vm1489_vm6, %vm1490_vm9 }
 0x514   : > { %v1486_v5 = vsub.f32 1.0, %v1485_v25  ;;  %vm4131_vm9 = vmmov %vm4129_vm4 }
 0x516   : > { %v1487_v11 = vmul.f32 %v2431_v63, %v1486_v5 }
 0x518   : > { %v1488_v56 = vadd.f32 %v2431_v63, %v1487_v11 }
 0x51a   : > { %v1492_v13 = vsel %vm1491_vm10, %v2431_v63, %v1488_v56 }
 0x51b   : > { %v1497_v18 = vsel %vm1494_vm3, %v1496_v6, %v1492_v13 }
 0x51c   : > { %v1498_v27 = vmul.f32 %v2429_v37, %v1497_v18 }
 0x51e   : > { %v1538_v9 = vperm.slane %v1498_v27, 3  ;;  %v1525_v51 = vperm.slane %v1498_v27, 2  ;;  %v1499_v36 = vperm.slane %v1498_v27, 0  ;;  %v1564_v21 = vperm.slane %v1498_v27, 5 }
 0x51f   : > { %v1512_v30 = vperm.slane %v1498_v27, 1  ;;  %v1577_v10 = vperm.slane %v1498_v27, 6  ;;  %v1590_v24 = vperm.slane %v1498_v27, 7  ;;  %v1551_v34 = vperm.slane %v1498_v27, 4 }
 0x520   : > { %1549 = vperm.xlu1 %2341, %v1538_v9   ;;  %1530 = vperm.xlu0 %2340, %v1525_v51  }
 0x521   : > { %1510 = vperm.xlu2 %2337, %v1499_v36  }
 0x528   : > { %1575 = vperm.xlu1 %2341, %v1564_v21   ;;  %2345 = vset.pattern.permute.xlu0 %v2893_v15 }
 0x529   : > { %1523 = vperm.xlu2 %2337, %v1512_v30  }
 0x530   : > { %1588 = vperm.xlu1 %2341, %v1577_v10   ;;  %1601 = vperm.xlu0 %2345, %v1590_v24  }
 0x531   : > { %2338 = vset.pattern.permute.xlu2 %v2884_v1 }
 0x538   : > { %2346 = vset.pattern.permute.xlu1 %v2884_v1 }
 0x539   : > { %1504 = vperm.xlu2 %2338, %v1499_v36  }
 0x540   : > { %1595 = vperm.xlu1 %2346, %v1590_v24  }
 0x541   : > { %1517 = vperm.xlu2 %2338, %v1512_v30  }
 0x549   : > { %2339 = vset.pattern.permute.xlu2 %v2893_v15 }
 0x551   : > { %1536 = vperm.xlu2 %2339, %v1525_v51  }
 0x559   : > { %2342 = vset.pattern.permute.xlu2 %v2884_v1 }
 0x561   : > { %1543 = vperm.xlu2 %2342, %v1538_v9   ;;  %v4092_v9 = vld [vmem:[#allocation22_spill] sm:$0xff] }
 0x569   : > { %2343 = vset.pattern.permute.xlu2 %v2893_v15 }
 0x571   : > { %1562 = vperm.xlu2 %2343, %v1551_v34  }
 0x579   : > { %2344 = vset.pattern.permute.xlu2 %v2884_v1 }
 0x57b   : > { %v1511_v47 = vpop.permute.xlu2 %1510 }
 0x57c   : > { %v1606_v59 = vmul.f32 %v3009_v60, %v1511_v47  ;;  %v1607_v33 = vmul.f32 %v3014_v61, %v1511_v47  ;;  %v1608_v15 = vmul.f32 %v3019_v62, %v1511_v47 }
 0x57e   : > { %v1651_v4 = vsel %vm806_vm13, %v1606_v59, 0.0  ;;  %v1659_v32 = vsel %vm806_vm13, %v1607_v33, 0.0  ;;  %v1667_v60 = vsel %vm806_vm13, %v1608_v15, 0.0 }
 0x581   : > { %1556 = vperm.xlu2 %2344, %v1551_v34   ;;  %v4094_v34 = vld [vmem:[#allocation39_spill] sm:$0xff] }
 0x583   : > { %v1524_v48 = vpop.permute.xlu2 %1523 }
 0x584   : > { %v1612_v61 = vmul.f32 %v3088_v16, %v1524_v48  ;;  %v1614_v22 = vmul.f32 %v3286_v31, %v1524_v48 }
 0x586   : > { %v1675_v55 = vsel %vm806_vm13, %v1612_v61, 0.0  ;;  %v1691_v63 = vsel %vm806_vm13, %v1614_v22, 0.0  ;;  %v4095_v61 = vld [vmem:[#allocation52_spill] sm:$0xff] }
 0x589   : > { %1569 = vperm.xlu2 %2344, %v1564_v21   ;;  %v4093_v21 = vld [vmem:[#allocation24_spill] sm:$0xff] }
 0x591   : > { %1582 = vperm.xlu2 %2344, %v1577_v10  }
 0x592   : > { %v1550_v57 = vpop.permute.xlu1 %1549 }
 0x593   : > { %v1505_v39 = vpop.permute.xlu2 %1504  ;;  %v1624_v11 = vmul.f32 %v3103_v20, %v1550_v57  ;;  %v1625_v27 = vmul.f32 %v3113_v23, %v1550_v57  ;;  %v1626_v47 = vmul.f32 %v4094_v34, %v1550_v57  ;;  %v1858_v57 = vld [vmem:[#allocation10 + $0x78] sm:$0xff] }
 0x594   : > { %v1603_v8 = vmul.f32 %v2966_v50, %v1505_v39  ;;  %v1604_v28 = vmul.f32 %v4088_v26, %v1505_v39  ;;  %v1605_v1 = vmul.f32 %v4089_v0, %v1505_v39  ;;  %v1613_v50 = vmul.f32 %v3094_v17, %v1524_v48  ;;  %v1531_v17 = vpop.permute.xlu0 %1530  ;;  %1939 = vmatpush.msra.mxu0 %v1858_v57 }
 0x595   : > { %v1616_v51 = vmul.f32 %v4092_v9, %v1531_v17  ;;  %v1617_v30 = vmul.f32 %v4093_v21, %v1531_v17  ;;  %v3721_v23 = vsel %vm806_vm13, %v1624_v11, 0.0  ;;  %v4100_v11 = vld [vmem:[#allocation53_spill] sm:$0xff]  ;;  %v1887_v9 = vld [vmem:[#allocation10 + $0x160] sm:$0xff] }
 0x596   : > { %v1652_v44 = vadd.f32 %v1651_v4, %v1603_v8  ;;  %v1660_v38 = vadd.f32 %v1659_v32, %v1604_v28  ;;  %v1668_v2 = vadd.f32 %v1667_v60, %v1605_v1  ;;  %v1683_v35 = vsel %vm806_vm13, %v1613_v50, 0.0  ;;  %v1874_v32 = vld [vmem:[#allocation10 + $0xf8] sm:$0xff] }
 0x597   : > { %v3726_v28 = vsel %vm806_vm13, %v1625_v27, 0.0  ;;  %v3731_v60 = vsel %vm806_vm13, %v1626_v47, 0.0  ;;  %1959 = vmatpush.msra.mxu1 %v1874_v32  ;;  %v1871_v27 = vld [vmem:[#allocation10 + $0xe0] sm:$0xff]  ;;  %v4102_v47 = vld [vmem:[#allocation54_spill] sm:$0xff]  ;;  %v1869_v32 = vld [vmem:[#allocation10 + $0xd0] sm:$0xff] }
 0x598   : > { %v1653_v49 = vrot.slane %v1652_v44, 4  ;;  %v1661_v14 = vrot.slane %v1660_v38, 4  ;;  %v1669_v37 = vrot.slane %v1668_v2, 4 }
 0x59a   : > { %v3692_v46 = vpop.permute.xlu1 %1575  ;;  %v1654_v25 = vadd.f32 %v1653_v49, %v1652_v44  ;;  %v1670_v7 = vadd.f32 %v1669_v37, %v1668_v2  ;;  %v1890_v44 = vld [vmem:[#allocation10 + $0x178] sm:$0xff]  ;;  %v1872_v37 = vld [vmem:[#allocation10 + $0xe8] sm:$0xff] }
 0x59b   : > { %v1518_v3 = vpop.permute.xlu2 %1517  ;;  %1979 = vmatpush.msra.mxu2 %v1890_v44 }
 0x59c   : > { %v1609_v62 = vmul.f32 %v2982_v54, %v1518_v3  ;;  %v1610_v19 = vmul.f32 %v4090_v40, %v1518_v3  ;;  %v1611_v53 = vmul.f32 %v2999_v58, %v1518_v3  ;;  %v1662_v58 = vadd.f32 %v1661_v14, %v1660_v38  ;;  %v1857_v40 = vld [vmem:[#allocation10 + $0x70] sm:$0xff] }
 0x59d   : > { %v1655_v36 = vrot.slane %v1654_v25, 2  ;;  %v1671_v48 = vrot.slane %v1670_v7, 2  ;;  %1940 = vmatpush.msra.mxu0 %v1857_v40 }
 0x59e   : > { %v1676_v29 = vadd.f32 %v1675_v55, %v1609_v62  ;;  %v1684_v12 = vadd.f32 %v1683_v35, %v1610_v19  ;;  %v1692_v41 = vadd.f32 %v1691_v63, %v1611_v53  ;;  %v1663_v10 = vrot.slane %v1662_v58, 2  ;;  %v1873_v19 = vld [vmem:[#allocation10 + $0xf0] sm:$0xff]  ;;  %v4096_v53 = vld [vmem:[#allocation46_spill] sm:$0xff]  ;;  %v1856_v35 = vld [vmem:[#allocation10 + $0x68] sm:$0xff] }
 0x59f   : > { %v1656_v15 = vadd.f32 %v1655_v36, %v1654_v25  ;;  %v1672_v38 = vadd.f32 %v1671_v48, %v1670_v7  ;;  %v4099_v63 = vld [vmem:[#allocation41_spill] sm:$0xff]  ;;  %1960 = vmatpush.msra.mxu1 %v1873_v19  ;;  %1941 = vmatpush.msra.mxu0 %v1856_v35 }
 0x5a0   : > { %v1677_v13 = vrot.slane %v1676_v29, 4  ;;  %v1685_v18 = vrot.slane %v1684_v12, 4  ;;  %v1693_v20 = vrot.slane %v1692_v41, 4  ;;  %v3728_v0 = vadd.f32 %v1663_v10, %v1662_v58  ;;  %v1870_v10 = vld [vmem:[#allocation10 + $0xd8] sm:$0xff] }
 0x5a1   : > { %v3744_v25 = vmul.f32 %v4099_v63, %v3692_v46  ;;  %1961 = vmatpush.msra.mxu1 %v1872_v37 }
 0x5a2   : > { %v3708_v31 = vpop.permute.xlu1 %1588  ;;  %v1678_v59 = vadd.f32 %v1677_v13, %v1676_v29  ;;  %v1686_v3 = vadd.f32 %v1685_v18, %v1684_v12  ;;  %v1602_v33 = vpop.permute.xlu0 %1601  ;;  %v1694_v1 = vadd.f32 %v1693_v20, %v1692_v41  ;;  %v4098_v12 = vld [vmem:[#allocation40_spill] sm:$0xff]  ;;  %v1665_v58 = vrot.slane %v3728_v0, 1  ;;  %v4101_v18 = vld [vmem:[#allocation47_spill] sm:$0xff] }
 0x5a3   : > { %v1648_v50 = vmul.f32 %v4095_v61, %v1602_v33  ;;  %v1649_v7 = vmul.f32 %v4100_v11, %v1602_v33  ;;  %v1650_v48 = vmul.f32 %v4102_v47, %v1602_v33  ;;  %1962 = vmatpush.msra.mxu1 %v1871_v27  ;;  %v4108_v11 = vld [vmem:[#allocation30_spill] sm:$0xff]  ;;  %v4111_v47 = vld [vmem:[#allocation49_spill] sm:$0xff] }
 0x5a4   : > { %v1679_v22 = vrot.slane %v1678_v59, 2  ;;  %v1687_v49 = vrot.slane %v1686_v3, 2  ;;  %v1695_v41 = vrot.slane %v1694_v1, 2  ;;  %v3764_v44 = vadd.f32 %v1665_v58, %v3728_v0  ;;  %v4105_v0 = vld [vmem:[#allocation44_spill] sm:$0xff]  ;;  %v1867_v58 = vld [vmem:[#allocation10 + $0xc0] sm:$0xff] }
 0x5a5   : > { %1963 = vmatpush.msra.mxu1 %v1870_v10  ;;  %v1835_v37 = vsel %vm806_vm13, %v1650_v48, 0.0  ;;  %v4110_v10 = vld [vmem:[#allocation48_spill] sm:$0xff] }
 0x5a6   : > { %v1688_v36 = vadd.f32 %v1687_v49, %v1686_v3  ;;  %v1827_v3 = vsel %vm806_vm13, %v1649_v7, 0.0  ;;  %v1868_v49 = vld [vmem:[#allocation10 + $0xc8] sm:$0xff] }
 0x5a7   : > { %1964 = vmatpush.msra.mxu1 %v1869_v32 }
 0x5a8   : > { %v1689_v19 = vrot.slane %v1688_v36, 1 }
 0x5a9   : > { %1965 = vmatpush.msra.mxu1 %v1868_v49  ;;  %v4115_v49 = vld [vmem:[#allocation31_spill] sm:$0xff] }
 0x5ab   : > { %v1537_v52 = vpop.permute.xlu2 %1536  ;;  %1966 = vmatpush.msra.mxu1 %v1867_v58 }
 0x5ac   : > { %v1618_v16 = vmul.f32 %v2944_v42, %v1537_v52  ;;  %v1619_v54 = vmul.f32 %v2947_v43, %v1537_v52  ;;  %v1620_v5 = vmul.f32 %v2951_v45, %v1537_v52  ;;  %v4091_v42 = vld [vmem:[#allocation21_spill] sm:$0xff] }
 0x5ad   : > { %v1615_v6 = vmul.f32 %v4091_v42, %v1531_v17  ;;  %v1889_v52 = vld [vmem:[#allocation10 + $0x170] sm:$0xff]  ;;  %v4097_v17 = vld [vmem:[#allocation38_spill] sm:$0xff]  ;;  %v1673_v42 = vrot.slane %v1672_v38, 1 }
 0x5ae   : > { %v1699_v56 = vsel %vm806_vm13, %v1618_v16, 0.0  ;;  %v1707_v43 = vsel %vm806_vm13, %v1619_v54, 0.0  ;;  %v1715_v45 = vsel %vm806_vm13, %v1620_v5, 0.0  ;;  %v1657_v16 = vrot.slane %v1656_v15, 1  ;;  %v1888_v5 = vld [vmem:[#allocation10 + $0x168] sm:$0xff]  ;;  %1980 = vmatpush.msra.mxu2 %v1889_v52 }
 0x5af   : > { %v1700_v24 = vadd.f32 %v1699_v56, %v1615_v6  ;;  %v1708_v39 = vadd.f32 %v1707_v43, %v1616_v51  ;;  %v1716_v8 = vadd.f32 %v1715_v45, %v1617_v30  ;;  %v1636_v29 = vmul.f32 %v4097_v17, %v3692_v46  ;;  %v1854_v30 = vld [vmem:[#allocation10 + $0x58] sm:$0xff] }
 0x5b0   : > { %v1637_v54 = vmul.f32 %v4098_v12, %v3692_v46  ;;  %v1819_v6 = vsel %vm806_vm13, %v1648_v50, 0.0  ;;  %v1855_v46 = vld [vmem:[#allocation10 + $0x60] sm:$0xff]  ;;  %v1680_v51 = vadd.f32 %v1679_v22, %v1678_v59  ;;  %1981 = vmatpush.msra.mxu2 %v1888_v5  ;;  %v3751_v20 = vadd.f32 %v1657_v16, %v1656_v15  ;;  %v1853_v15 = vld [vmem:[#allocation10 + $0x50] sm:$0xff]  ;;  %v1884_v16 = vld [vmem:[#allocation10 + $0x148] sm:$0xff] }
 0x5b1   : > { %v1701_v4 = vrot.slane %v1700_v24, 4  ;;  %v1709_v2 = vrot.slane %v1708_v39, 4  ;;  %v1717_v14 = vrot.slane %v1716_v8, 4  ;;  %1942 = vmatpush.msra.mxu0 %v1855_v46  ;;  %v1696_v59 = vadd.f32 %v1695_v41, %v1694_v1  ;;  %v1885_v1 = vld [vmem:[#allocation10 + $0x150] sm:$0xff]  ;;  %v1851_v5 = vld [vmem:[#allocation10 + $0x40] sm:$0xff] }
 0x5b2   : > { %v3723_v26 = vpop.permute.xlu1 %1595  ;;  %v3757_v34 = vsel %vm806_vm13, %v1637_v54, 0.0  ;;  %1982 = vmatpush.msra.mxu2 %v1887_v9  ;;  %v3766_v61 = vadd.f32 %v1673_v42, %v1672_v38  ;;  %v1681_v40 = vrot.slane %v1680_v51, 1  ;;  %v3774_v38 = vmul.f32 %v4105_v0, %v3708_v31  ;;  %v4107_v54 = vld [vmem:[#allocation29_spill] sm:$0xff]  ;;  %v4109_v42 = vld [vmem:[#allocation34_spill] sm:$0xff] }
 0x5b3   : > { %v1645_v55 = vmul.f32 %v4096_v53, %v3723_v26  ;;  %v1702_v56 = vadd.f32 %v1701_v4, %v1700_v24  ;;  %v1710_v13 = vadd.f32 %v1709_v2, %v1708_v39  ;;  %v1646_v43 = vmul.f32 %v4101_v18, %v3723_v26  ;;  %v1886_v39 = vld [vmem:[#allocation10 + $0x158] sm:$0xff]  ;;  %1943 = vmatpush.msra.mxu0 %v1854_v30 }
 0x5b4   : > { %v1718_v45 = vadd.f32 %v1717_v14, %v1716_v8  ;;  %v3754_v24 = vsel %vm806_vm13, %v1636_v29, 0.0  ;;  %v4103_v4 = vld [vmem:[#allocation50_spill] sm:$0xff]  ;;  %1983 = vmatpush.msra.mxu2 %v1886_v39  ;;  %v4104_v14 = vld [vmem:[#allocation43_spill] sm:$0xff]  ;;  %v1697_v17 = vrot.slane %v1696_v59, 1  ;;  %v3793_v18 = vadd.f32 %v1681_v40, %v1680_v51 }
 0x5b5   : > { %v1820_v21 = vadd.f32 %v1819_v6, %v1645_v55  ;;  %v1703_v8 = vrot.slane %v1702_v56, 2  ;;  %v1647_v57 = vmul.f32 %v4103_v4, %v3723_v26  ;;  %v1711_v50 = vrot.slane %v1710_v13, 2  ;;  %v1852_v26 = vld [vmem:[#allocation10 + $0x48] sm:$0xff]  ;;  %v4106_v55 = vld [vmem:[#allocation45_spill] sm:$0xff]  ;;  %1944 = vmatpush.msra.mxu0 %v1853_v15  ;;  %v1866_v9 = vld [vmem:[#allocation10 + $0xb8] sm:$0xff] }
 0x5b6   : > { %v1828_v33 = vadd.f32 %v1827_v3, %v1646_v43  ;;  %v1719_v52 = vrot.slane %v1718_v45, 2  ;;  %v3770_v53 = vmul.f32 %v4104_v14, %v3708_v31  ;;  %v3778_v35 = vmul.f32 %v4106_v55, %v3708_v31  ;;  %1984 = vmatpush.msra.mxu2 %v1885_v1  ;;  %v4112_v39 = vld [vmem:[#allocation51_spill] sm:$0xff]  ;;  %v1865_v4 = vld [vmem:[#allocation10 + $0xb0] sm:$0xff]  ;;  %1967 = vmatpush.msra.mxu1 %v1866_v9  ;;  %v418_v40 = vld [vmem:[#allocation8 + $0x58] sm:$0xff] }
 0x5b7   : > { %v1821_v22 = vrot.slane %v1820_v21, 4  ;;  %v3781_v29 = vadd.f32 %v1703_v8, %v1702_v56  ;;  %v3783_v12 = vadd.f32 %v1835_v37, %v1647_v57  ;;  %v3787_v41 = vadd.f32 %v1711_v50, %v1710_v13  ;;  %1945 = vmatpush.msra.mxu0 %v1852_v26  ;;  %v1883_v56 = vld [vmem:[#allocation10 + $0x140] sm:$0xff]  ;;  %v1850_v13 = vld [vmem:[#allocation10 + $0x38] sm:$0xff]  ;;  %v1881_v1 = vld [vmem:[#allocation10 + $0x130] sm:$0xff] }
 0x5b8   : > { %v1829_v31 = vrot.slane %v1828_v33, 4  ;;  %v3795_v43 = vadd.f32 %v1689_v19, %v1688_v36  ;;  %v3797_v46 = vadd.f32 %v1719_v52, %v1718_v45  ;;  %1985 = vmatpush.msra.mxu2 %v1884_v16  ;;  %v3803_v30 = vsel %vm806_vm13, %v3744_v25, 0.0  ;;  %v1882_v36 = vld [vmem:[#allocation10 + $0x138] sm:$0xff]  ;;  %v1849_v25 = vld [vmem:[#allocation10 + $0x30] sm:$0xff]  ;;  %v4113_v19 = vld [vmem:[#allocation23_spill] sm:$0xff]  ;;  %1968 = vmatpush.msra.mxu1 %v1865_v4 }
 0x5b9   : > { %v3799_v27 = vadd.f32 %v1821_v22, %v1820_v21  ;;  %1946 = vmatpush.msra.mxu0 %v1851_v5  ;;  %v3808_v45 = vadd.f32 %v1697_v17, %v1696_v59  ;;  %v1705_v21 = vrot.slane %v3781_v29, 1  ;;  %v1837_v3 = vrot.slane %v3783_v12, 4  ;;  %v422_v57 = vld [vmem:[#allocation8 + $0x78] sm:$0xff]  ;;  %v4114_v22 = vld [vmem:[#allocation25_spill] sm:$0xff]  ;;  %v1848_v14 = vld [vmem:[#allocation10 + $0x28] sm:$0xff] }
 0x5ba   : > { %1986 = vmatpush.msra.mxu2 %v1883_v56  ;;  %v1713_v15 = vrot.slane %v3787_v41, 1  ;;  %v3814_v32 = vadd.f32 %v1829_v31, %v1828_v33  ;;  %499 = vmatpush.msrb.mxu3 %v422_v57  ;;  %v1880_v16 = vld [vmem:[#allocation10 + $0x128] sm:$0xff]  ;;  %v414_v17 = vld [vmem:[#allocation8 + $0x38] sm:$0xff]  ;;  %v1847_v31 = vld [vmem:[#allocation10 + $0x20] sm:$0xff]  ;;  %v3857_v4 = vsel %vm806_vm13, %v3774_v38, 0.0 }
 0x5bb   : > { %v3734_v62 = vpop.permute.xlu2 %1543  ;;  %1947 = vmatpush.msra.mxu0 %v1850_v13  ;;  %v1879_v13 = vld [vmem:[#allocation10 + $0x120] sm:$0xff]  ;;  %v410_v9 = vld [vmem:[#allocation8 + $0x18] sm:$0xff]  ;;  %v1860_v38 = vld [vmem:[#allocation10 + $0x88] sm:$0xff] }
 0x5bc   : > { %v1621_v63 = vmul.f32 %v4107_v54, %v3734_v62  ;;  %v1622_v7 = vmul.f32 %v4108_v11, %v3734_v62  ;;  %v1623_v6 = vmul.f32 %v4109_v42, %v3734_v62  ;;  %1987 = vmatpush.msra.mxu2 %v1882_v36  ;;  %v1863_v11 = vld [vmem:[#allocation10 + $0xa0] sm:$0xff]  ;;  %500 = vmatpush.msrb.mxu3 %v418_v40  ;;  %v1878_v36 = vld [vmem:[#allocation10 + $0x118] sm:$0xff] }
 0x5bd   : > { %1948 = vmatpush.msra.mxu0 %v1849_v25  ;;  %v1706_v42 = vadd.f32 %v1705_v21, %v3781_v29  ;;  %v1915_v29 = vsel %vm779_vm8, %v3793_v18, %v3751_v20  ;;  %v1831_v21 = vrot.slane %v3814_v32, 2  ;;  %v1845_v20 = vld [vmem:[#allocation10 + $0x10] sm:$0xff] }
 0x5be   : > { %v1724_v8 = vadd.f32 %v3721_v23, %v1621_v63  ;;  %v3817_v50 = vadd.f32 %v3726_v28, %v1622_v7  ;;  %v3820_v59 = vadd.f32 %v3731_v60, %v1623_v6  ;;  %v1721_v23 = vrot.slane %v3797_v46, 1  ;;  %v1864_v28 = vld [vmem:[#allocation10 + $0xa8] sm:$0xff]  ;;  %1988 = vmatpush.msra.mxu2 %v1881_v1  ;;  %501 = vmatpush.msrb.mxu3 %v414_v17  ;;  %v1861_v18 = vld [vmem:[#allocation10 + $0x90] sm:$0xff] }
 0x5bf   : > { %v1823_v60 = vrot.slane %v3799_v27, 2  ;;  %v3832_v7 = vsel %vm806_vm13, %v3770_v53, 0.0  ;;  %1949 = vmatpush.msra.mxu0 %v1848_v14  ;;  %1969 = vmatpush.msra.mxu1 %v1864_v28  ;;  %v1862_v53 = vld [vmem:[#allocation10 + $0x98] sm:$0xff]  ;;  %v1844_v1 = vld [vmem:[#allocation10 + $0x8] sm:$0xff] }
 0x5c0   : > { %v1725_v54 = vrot.slane %v1724_v8, 4  ;;  %v1733_v6 = vrot.slane %v3817_v50, 4  ;;  %v1741_v56 = vrot.slane %v3820_v59, 4  ;;  %1989 = vmatpush.msra.mxu2 %v1880_v16  ;;  %502 = vmatpush.msrb.mxu3 %v410_v9 }
 0x5c1   : > { %1950 = vmatpush.msra.mxu0 %v1847_v31  ;;  %1970 = vmatpush.msra.mxu1 %v1863_v11 }
 0x5c2   : > { %1990 = vmatpush.msra.mxu2 %v1879_v13 }
 0x5c3   : > { %1971 = vmatpush.msra.mxu1 %v1862_v53  ;;  %v4123_v53 = vld [vmem:[#allocation36_spill] sm:$0xff] }
 0x5c4   : > { %1991 = vmatpush.msra.mxu2 %v1878_v36  ;;  %v4125_v36 = vld [vmem:[#allocation42_spill] sm:$0xff] }
 0x5c5   : > { %1972 = vmatpush.msra.mxu1 %v1861_v18 }
 0x5c7   : > { %1973 = vmatpush.msra.mxu1 %v1860_v38 }
 0x5cb   : > { %v1563_v2 = vpop.permute.xlu2 %1562 }
 0x5cc   : > { %v1630_v62 = vmul.f32 %v4110_v10, %v1563_v2  ;;  %v1631_v48 = vmul.f32 %v4111_v47, %v1563_v2  ;;  %v1632_v51 = vmul.f32 %v4112_v39, %v1563_v2  ;;  %v1714_v10 = vadd.f32 %v1713_v15, %v3787_v41  ;;  %v4117_v15 = vld [vmem:[#allocation32_spill] sm:$0xff] }
 0x5cd   : > { %v1722_v39 = vadd.f32 %v1721_v23, %v3797_v46  ;;  %v1929_v41 = vsel %vm779_vm8, %v3808_v45, %v3766_v61  ;;  %v3853_v46 = vadd.f32 %v1823_v60, %v3799_v27  ;;  %v1742_v61 = vadd.f32 %v1741_v56, %v3820_v59  ;;  %v1877_v45 = vld [vmem:[#allocation10 + $0x110] sm:$0xff]  ;;  %v1843_v60 = vld [vmem:[#allocation10] sm:$0xff] }
 0x5ce   : > { %v1747_v0 = vsel %vm806_vm13, %v1630_v62, 0.0  ;;  %v1755_v55 = vsel %vm806_vm13, %v1631_v48, 0.0  ;;  %v1763_v37 = vsel %vm806_vm13, %v1632_v51, 0.0  ;;  %v3839_v62 = vadd.f32 %v1837_v3, %v3783_v12  ;;  %v1846_v48 = vld [vmem:[#allocation10 + $0x18] sm:$0xff]  ;;  %1992 = vmatpush.msra.mxu2 %v1877_v45 }
 0x5cf   : > { %v1922_v12 = vsel %vm779_vm8, %v3795_v43, %v3764_v44  ;;  %v1726_v3 = vadd.f32 %v1725_v54, %v1724_v8  ;;  %v1734_v44 = vadd.f32 %v1733_v6, %v3817_v50  ;;  %1951 = vmatpush.msra.mxu0 %v1846_v48  ;;  %vm4116_vm8 = vmmov %vm4085_vm15  ;;  %v2434_v50 = vld [vmem:[%s332_s27] sm:$0xff]  ;;  %v1811_v59 = vsel %vm806_vm13, %v3778_v35, 0.0  ;;  %v1875_v54 = vld [vmem:[#allocation10 + $0x100] sm:$0xff] }
 0x5d0   : > { %v3862_v8 = vsel %vm4116_vm8, %v1706_v42, %v1915_v29  ;;  %v1839_v57 = vrot.slane %v3839_v62, 2  ;;  %vm4118_vm14 = vmmov %vm4116_vm8  ;;  %2190 = vmatmul.msk.f32.vlgmr.msrb.gmra.mxu3 %vm4119_vm11, %v2434_v50  ;;  %v1743_v35 = vrot.slane %v1742_v61, 2 }
 0x5d1   : > { %v3867_v40 = vsel %vm4118_vm14, %v1714_v10, %v1922_v12  ;;  %1952 = vmatpush.msra.mxu0 %v1845_v20  ;;  %vm4122_vm13 = vmmov %vm4116_vm8 }
 0x5d2   : > { %v1744_v9 = vadd.f32 %v1743_v35, %v1742_v61  ;;  %vm4128_vm15 = vmmov %vm4126_vm0 }
 0x5d3   : > { %1953 = vmatpush.msra.mxu0 %v1844_v1 }
 0x5d5   : > { %1954 = vmatpush.msra.mxu0 %v1843_v60 }
 0x5db   : > { %v1557_v2 = vpop.permute.xlu2 %1556 }
 0x5dc   : > { %v1627_v52 = vmul.f32 %v4113_v19, %v1557_v2  ;;  %v1628_v26 = vmul.f32 %v4114_v22, %v1557_v2  ;;  %v1629_v33 = vmul.f32 %v4115_v49, %v1557_v2  ;;  %v4120_v19 = vld [vmem:[#allocation33_spill] sm:$0xff]  ;;  %v4121_v22 = vld [vmem:[#allocation35_spill] sm:$0xff]  ;;  %v1876_v49 = vld [vmem:[#allocation10 + $0x108] sm:$0xff] }
 0x5dd   : > { %1993 = vmatpush.msra.mxu2 %v1876_v49 }
 0x5de   : > { %v1748_v63 = vadd.f32 %v1747_v0, %v1627_v52  ;;  %v1756_v5 = vadd.f32 %v1755_v55, %v1628_v26  ;;  %v1764_v58 = vadd.f32 %v1763_v37, %v1629_v33  ;;  %v1727_v33 = vrot.slane %v1726_v3, 2  ;;  %v1859_v0 = vld [vmem:[#allocation10 + $0x80] sm:$0xff] }
 0x5df   : > { %v3878_v55 = vadd.f32 %v1831_v21, %v3814_v32  ;;  %v1735_v37 = vrot.slane %v1734_v44, 2  ;;  %1974 = vmatpush.msra.mxu1 %v1859_v0  ;;  %1994 = vmatpush.msra.mxu2 %v1875_v54 }
 0x5e0   : > { %v1749_v47 = vrot.slane %v1748_v63, 4  ;;  %v1757_v51 = vrot.slane %v1756_v5, 4  ;;  %v1765_v25 = vrot.slane %v1764_v58, 4 }
 0x5e1   : > { %v1833_v56 = vrot.slane %v3878_v55, 1  ;;  %v1736_v13 = vadd.f32 %v1735_v37, %v1734_v44 }
 0x5e2   : > { %v1750_v27 = vadd.f32 %v1749_v47, %v1748_v63  ;;  %v1758_v23 = vadd.f32 %v1757_v51, %v1756_v5  ;;  %v1766_v14 = vadd.f32 %v1765_v25, %v1764_v58  ;;  %v1825_v5 = vrot.slane %v3853_v46, 1 }
 0x5e3   : > { %v1570_v43 = vpop.permute.xlu2 %1569  ;;  %v3887_v58 = vsel %vm4122_vm13, %v1722_v39, %v1929_v41  ;;  %v4124_v39 = vld [vmem:[#allocation37_spill] sm:$0xff] }
 0x5e4   : > { %v1633_v2 = vmul.f32 %v4117_v15, %v1570_v43  ;;  %v1634_v52 = vmul.f32 %v4120_v19, %v1570_v43  ;;  %v1635_v26 = vmul.f32 %v4121_v22, %v1570_v43  ;;  %v1751_v32 = vrot.slane %v1750_v27, 2 }
 0x5e5   : > { %v1759_v31 = vrot.slane %v1758_v23, 2  ;;  %v1745_v19 = vrot.slane %v1744_v9, 1  ;;  %v1826_v54 = vadd.f32 %v1825_v5, %v3853_v46  ;;  %v1834_v46 = vadd.f32 %v1833_v56, %v3878_v55 }
 0x5e6   : > { %v1772_v28 = vadd.f32 %v3754_v24, %v1633_v2  ;;  %v1780_v16 = vadd.f32 %v3757_v34, %v1634_v52  ;;  %v1788_v17 = vadd.f32 %v3803_v30, %v1635_v26  ;;  %v3884_v24 = vadd.f32 %v1839_v57, %v3839_v62 }
 0x5e7   : > { %v1728_v34 = vadd.f32 %v1727_v33, %v1726_v3  ;;  %v1767_v30 = vrot.slane %v1766_v14, 2  ;;  %v1752_v41 = vadd.f32 %v1751_v32, %v1750_v27  ;;  %v1760_v21 = vadd.f32 %v1759_v31, %v1758_v23 }
 0x5e8   : > { %v1773_v63 = vrot.slane %v1772_v28, 4  ;;  %v1781_v11 = vrot.slane %v1780_v16, 4  ;;  %v1789_v42 = vrot.slane %v1788_v17, 4  ;;  %v1737_v2 = vrot.slane %v1736_v13, 1 }
 0x5e9   : > { %v1768_v20 = vadd.f32 %v1767_v30, %v1766_v14  ;;  %v1729_v43 = vrot.slane %v1728_v34, 1  ;;  %v1753_v52 = vrot.slane %v1752_v41, 1  ;;  %v1761_v27 = vrot.slane %v1760_v21, 1 }
 0x5ea   : > { %v1774_v6 = vadd.f32 %v1773_v63, %v1772_v28  ;;  %v1782_v10 = vadd.f32 %v1781_v11, %v1780_v16  ;;  %v1790_v62 = vadd.f32 %v1789_v42, %v1788_v17  ;;  %v1841_v23 = vrot.slane %v3884_v24, 1 }
 0x5eb   : > { %v1583_v47 = vpop.permute.xlu2 %1582  ;;  %v1769_v22 = vrot.slane %v1768_v20, 1  ;;  %v1730_v33 = vadd.f32 %v1729_v43, %v1728_v34  ;;  %v1738_v28 = vadd.f32 %v1737_v2, %v1736_v13  ;;  %v1746_v35 = vadd.f32 %v1745_v19, %v1744_v9  ;;  %v2347_v43 = vld [vmem:[%s3960_s6] ss:$0 sm:$0xff] }
 0x5ec   : > { %v1775_v48 = vrot.slane %v1774_v6, 2  ;;  %v1639_v29 = vmul.f32 %v4123_v53, %v1583_v47  ;;  %v1640_v51 = vmul.f32 %v4124_v39, %v1583_v47  ;;  %v1641_v12 = vmul.f32 %v4125_v36, %v1583_v47 }
 0x5ed   : > { %v1783_v3 = vrot.slane %v1782_v10, 2  ;;  %v1791_v25 = vrot.slane %v1790_v62, 2  ;;  %v1754_v16 = vadd.f32 %v1753_v52, %v1752_v41  ;;  %v1762_v17 = vadd.f32 %v1761_v27, %v1760_v21 }
 0x5ee   : > { %v1796_v18 = vadd.f32 %v3832_v7, %v1639_v29  ;;  %v1804_v44 = vadd.f32 %v3857_v4, %v1640_v51  ;;  %v1812_v61 = vadd.f32 %v1811_v59, %v1641_v12  ;;  %v1776_v45 = vadd.f32 %v1775_v48, %v1774_v6 }
 0x5ef   : > { %v1784_v57 = vadd.f32 %v1783_v3, %v1782_v10  ;;  %v1792_v15 = vadd.f32 %v1791_v25, %v1790_v62  ;;  %v1770_v63 = vadd.f32 %v1769_v22, %v1768_v20  ;;  %v1917_v34 = vsel %vm789_vm1, %v1730_v33, %v3862_v8 }
 0x5f0   : > { %v1797_v1 = vrot.slane %v1796_v18, 4  ;;  %v1805_v38 = vrot.slane %v1804_v44, 4  ;;  %v1813_v50 = vrot.slane %v1812_v61, 4  ;;  %v1777_v4 = vrot.slane %v1776_v45, 1 }
 0x5f1   : > { %v1785_v59 = vrot.slane %v1784_v57, 1  ;;  %v1793_v14 = vrot.slane %v1792_v15, 1  ;;  %v1924_v62 = vsel %vm789_vm1, %v1738_v28, %v3867_v40  ;;  %v1918_v47 = vsel %vm4126_vm0, %v1754_v16, %v1917_v34 }
 0x5f2   : > { %v1798_v26 = vadd.f32 %v1797_v1, %v1796_v18  ;;  %v1806_v49 = vadd.f32 %v1805_v38, %v1804_v44  ;;  %v1814_v7 = vadd.f32 %v1813_v50, %v1812_v61  ;;  %v1778_v42 = vadd.f32 %v1777_v4, %v1776_v45 }
 0x5f3   : > { %v1786_v30 = vadd.f32 %v1785_v59, %v1784_v57  ;;  %v1794_v6 = vadd.f32 %v1793_v14, %v1792_v15  ;;  %v1925_v5 = vsel %vm4127_vm12, %v1762_v17, %v1924_v62  ;;  %v1931_v48 = vsel %vm789_vm1, %v1746_v35, %v3887_v58 }
 0x5f4   : > { %v1799_v60 = vrot.slane %v1798_v26, 2  ;;  %v1807_v0 = vrot.slane %v1806_v49, 2  ;;  %v1815_v37 = vrot.slane %v1814_v7, 2  ;;  %v1932_v39 = vsel %vm4128_vm15, %v1770_v63, %v1931_v48 }
 0x5f5   : > { %v1919_v51 = vsel %vm799_vm2, %v1778_v42, %v1918_v47  ;;  %v1926_v36 = vsel %vm799_vm2, %v1786_v30, %v1925_v5  ;;  %v1842_v40 = vadd.f32 %v1841_v23, %v3884_v24  ;;  %v1933_v12 = vsel %vm799_vm2, %v1794_v6, %v1932_v39 }
 0x5f6   : > { %v1800_v32 = vadd.f32 %v1799_v60, %v1798_v26  ;;  %v1808_v31 = vadd.f32 %v1807_v0, %v1806_v49  ;;  %v1816_v11 = vadd.f32 %v1815_v37, %v1814_v7 }
 0x5f8   : > { %v1801_v10 = vrot.slane %v1800_v32, 1  ;;  %v1809_v13 = vrot.slane %v1808_v31, 1  ;;  %v1817_v9 = vrot.slane %v1816_v11, 1 }
 0x5fa   : > { %v1802_v53 = vadd.f32 %v1801_v10, %v1800_v32  ;;  %v1810_v29 = vadd.f32 %v1809_v13, %v1808_v31  ;;  %v1818_v8 = vadd.f32 %v1817_v9, %v1816_v11 }
 0x5fc   : > { %v1920_v55 = vsel %vm4129_vm4, %v1802_v53, %v1919_v51  ;;  %v1927_v56 = vsel %vm4130_vm5, %v1810_v29, %v1926_v36  ;;  %v1934_v41 = vsel %vm4131_vm9, %v1818_v8, %v1933_v12 }
 0x5fd   : > { %v1921_v58 = vsel %vm1062_vm7, %v1826_v54, %v1920_v55  ;;  %v1928_v21 = vsel %vm1062_vm7, %v1834_v46, %v1927_v56  ;;  %v1935_v3 = vsel %vm1062_vm7, %v1842_v40, %v1934_v41 }
 0x5fe   : > { %1955 = vmatmul.f32.vlgmr.msra.gmra.mxu0 %v1921_v58  ;;  %1975 = vmatmul.f32.vlgmr.msra.gmra.mxu1 %v1928_v21 }
 0x5ff   : > { %1995 = vmatmul.f32.vlgmr.msra.gmra.mxu2 %v1935_v3 }
 0x653   : > { %v504_v44 = vpop.f32.mrf.mxu3 }
 0x67b   : > { %v1956_v25 = vpop.f32.mrf.mxu0  ;;  %v1976_v20 = vpop.f32.mrf.mxu1 }
 0x67c   : > { %v1977_v24 = vadd.f32 %v1976_v20, %v1956_v25 }
 0x682   : > { %v1996_v18 = vpop.f32.mrf.mxu2 }
 0x683   : > { %v1997_v61 = vadd.f32 %v1996_v18, %v1977_v24 }
 0x685   : > { %v1999_v45 = vadd.f32 %v1997_v61, %v504_v44 }
 0x687   : > { %v2004_v57 = vadd.f32 %v2347_v43, %v1999_v45 }
 0x689   : > { %v2005_v15 = vmul.f32 %v2004_v57, %v2004_v57 }
 0x68b   : > { %2006 = vadd.xlane.f32.xlu2 %v2005_v15 }
 0x6fe   : > { %v2007_v2 = vpop.xlane.xlu2 %2006 }
 0x6ff   : > { %v2008_v1 = vadd.f32 1e-16, %v2007_v2 }
 0x701   : > { %2432 = vrsqrt.f32 %v2008_v1  ;;  %vm2015_vm1 = vweird.f32 %v2008_v1 }
 0x707   : > { %v2433_v38 = vpop.eup %2432 }
 0x708   : > { %v2010_v50 = vmul.f32 %v2433_v38, %v2008_v1  ;;  %vm2016_vm2 = vweird.f32 %v2433_v38 }
 0x709   : > { %vm2017_vm7 = vmor %vm2015_vm1, %vm2016_vm2 }
 0x70a   : > { %v2011_v19 = vmul.f32 %v2433_v38, %v2010_v50 }
 0x70c   : > { %v2012_v52 = vmul.f32 0.5, %v2011_v19 }
 0x70e   : > { %v2013_v27 = vsub.f32 1.5, %v2012_v52 }
 0x710   : > { %v2014_v23 = vmul.f32 %v2433_v38, %v2013_v27 }
 0x712   : > { %v2018_v22 = vsel %vm2017_vm7, %v2433_v38, %v2014_v23 }
 0x713   : > { %v2019_v26 = vmul.f32 %v2018_v22, %v2004_v57 }
 0x715   : > { %2020 = vst [vmem:[%s403_s19] sm:$0xff] %v2019_v26 }
 0x716   : > { %2612 = shalt.err (!%p2609_p10)
}
 0x717   : > { %2257 = dma.vmem_to_hbm [thread:$0]  (%p2775_p0), %s2035_s22, 128, %s2037_s14, %s2022_s8  }
 0x718 PF: > { %s4132_s28 = sld [smem:[#allocation16_spill]] }
 0x719   : > { %s4134_s1 = sld [smem:[#allocation17_spill]] }
 0x71e   : > { %s2048_s20 = sand.u32 1, %s4132_s28  }
 0x71f   : > { %p4135_p6 = scmp.ge.s32.totalorder %s4134_s1, 2  ;;  %s2049_s24 = scalar_lea.sflag [#allocation4], %s2048_s20 }
 0x721   : > { %p2277_p11 = pnand %p4135_p6, %p2781_p5 }
 0x723   : > { %p2278_p12 = pneg %p2277_p11 }
 0x725   : > { %2642 = dma.done.wait (%p2278_p12), %s2049_s24, 128  }
 0x726   : > { %2644 = vsyncadd (%p2278_p12), %s2049_s24, 4294967168  ;;  %s4136_s27 = sld [smem:[#allocation18_spill]]  ;;  %s4138_s24 = smov %s2651_s25 }
 0x727   : > { %s4137_s23 = sld [smem:[#allocation19_spill]]  ;;  %s4139_s25 = smov %s2655_s26 }
 0x72c   : > { %p24_p3 = scmp.ge.s32.totalorder %s4136_s27, 4  }
 0x72d   : > { %s4140_s26 = smov %s4137_s23 }
 0x72e   :  { %26 = sbr.rel (!%p24_p3) target bundleno = 11 (0xb), region = 125 }
 0x733   :  { %2055 = vsyncpa [#allocation3], 1 }
 0x734   :  { %2057 = vsyncpa [#allocation3 + $0x1], 1 }
 0x735   :  { %2058 = vsyncpa [#allocation6], 1 }
 0x736   :  { %2060 = vsyncpa [#allocation6 + $0x1], 1 }
 0x737   :  { %2061 = vsyncpa [#allocation9], 1 }
 0x738   :  { %2062 = vsyncpa [#allocation4], 1 }
 0x739   :  { %2064 = vsyncpa [#allocation4 + $0x1], 1 }

</bundles_post_ra>
